<compile_context>
chip_gen: v7x
topology: tpu7x:2x2x1
jax: 0.10.0
libtpu: 0.0.40
codegen_flags: <defaults>
</compile_context>

<pallas_src>
import functools

import jax
import jax.numpy as jnp
from jax import lax
from jax.experimental import pallas as pl
from jax.experimental.pallas import tpu as pltpu


def _round_up(x, m):
    return (x + m - 1) // m * m


def _largest_divisor_leq(n, cap):
    for d in range(min(n, cap), 0, -1):
        if n % d == 0:
            return d
    return 1


def _rnn_chunk_kernel(h0_ref,      # (BP, HP)        f32 initial hidden (padded)
                      xproj_ref,   # (TT, BP, HP+OP) f32 x_t @ Wx + b_fused (hoisted)
                      wh_ref,      # (HP, HP+OP)     bf16 fused [i2h|i2o] hidden-half
                      woh_ref,     # (HP, OP)        bf16 o2o hidden-half
                      woo_ref,     # (OP, OP)        bf16 o2o output-half
                      bo_ref,      # (1, OP)         f32  b_o2o (pad lanes = -1e30)
                      out_ref,     # (TT, BP, OP)    f32  log-softmax outputs
                      hid_ref,     # (BP, HP)        f32  resident hidden accumulator
                      *, hp, tt, t_valid, mask_tail):
    chunk = pl.program_id(0)

    @pl.when(chunk == 0)
    def _():
        hid_ref[...] = h0_ref[...]

    bp, op = out_ref.shape[1], out_ref.shape[2]
    # Loop-invariant broadcast hoisted out of the time loop (JAX does not CSE
    # broadcast_in_dim).  Padded-lane -1e30 mask is already baked into bo.
    bo_b = jnp.broadcast_to(bo_ref[...], (bp, op))

    def step(i, h):
        # Recurrent half only; x-projection + fused bias precomputed outside.
        fused = xproj_ref[i] + jnp.dot(h.astype(jnp.bfloat16), wh_ref[...],
                                       preferred_element_type=jnp.float32)
        h_new = fused[:, :hp]                 # (BP, HP) — 128-aligned slice
        out1 = fused[:, hp:]                  # (BP, OP) — 128-aligned slice

        out2 = (jnp.dot(h_new.astype(jnp.bfloat16), woh_ref[...],
                        preferred_element_type=jnp.float32)
                + jnp.dot(out1.astype(jnp.bfloat16), woo_ref[...],
                          preferred_element_type=jnp.float32)
                + bo_b)                       # padded lanes pushed to ~-1e30

        # TODO(synk): nn.Dropout(0.1) is identity in eval mode; training-mode
        #             stochastic masking (pltpu.prng_*) is not implemented.

        # Numerically-stable log_softmax over dim=1 (padded lanes underflow to 0).
        m = jnp.max(out2, axis=-1, keepdims=True)
        shifted = out2 - m
        lse = jnp.log(jnp.sum(jnp.exp(shifted), axis=-1, keepdims=True))
        out_ref[i] = (shifted - lse).astype(out_ref.dtype)

        if mask_tail:  # trace-time flag; only present when T % TT != 0
            h_new = jnp.where(chunk * tt + i < t_valid, h_new, h)
        return h_new

    h_final = lax.fori_loop(0, tt, step, hid_ref[...], unroll=(tt <= 16))
    hid_ref[...] = h_final


def prepare_params(torch_params, input_size, hidden_size, output_size):
    """One-time (outside jit) weight re-layout: transpose, split into
    input/hidden halves, fuse i2h|i2o, zero-pad to lane-aligned widths,
    bake the padded-lane softmax mask into the o2o bias, cast recurrent
    weights to bf16."""
    I, H, O = input_size, hidden_size, output_size
    HP = _round_up(max(H, 128), 128)
    OP = _round_up(max(O, 128), 128)
    f32, bf16 = jnp.float32, jnp.bfloat16

    w_i2h_t = torch_params["w_i2h"].astype(f32).T        # (I+H, H)
    w_i2o_t = torch_params["w_i2o"].astype(f32).T        # (I+H, O)
    w_o2o_t = torch_params["w_o2o"].astype(f32).T        # (H+O, O)

    # Input-half of fused [i2h | i2o] + fused bias: consumed OUTSIDE the kernel
    # in the hoisted x-projection, kept f32.
    wx = jnp.zeros((I, HP + OP), f32)
    wx = wx.at[:, :H].set(w_i2h_t[:I]).at[:, HP:HP + O].set(w_i2o_t[:I])
    bf = jnp.zeros((1, HP + OP), f32)
    bf = bf.at[0, :H].set(torch_params["b_i2h"].astype(f32))
    bf = bf.at[0, HP:HP + O].set(torch_params["b_i2o"].astype(f32))

    # Recurrent weights: bf16 (native MXU path), f32 accumulation in-kernel.
    wh = jnp.zeros((HP, HP + OP), f32)
    wh = wh.at[:H, :H].set(w_i2h_t[I:]).at[:H, HP:HP + O].set(w_i2o_t[I:])
    woh = jnp.zeros((HP, OP), f32).at[:H, :O].set(w_o2o_t[:H])
    woo = jnp.zeros((OP, OP), f32).at[:O, :O].set(w_o2o_t[H:])

    # o2o bias with padded-lane mask folded in (-1e30 on lanes >= O): replaces
    # the per-step iota + where in the kernel.
    bo = jnp.full((1, OP), -1e30, f32).at[0, :O].set(
        torch_params["b_o2o"].astype(f32))

    return {"wx": wx, "bf": bf,
            "wh": wh.astype(bf16), "woh": woh.astype(bf16),
            "woo": woo.astype(bf16), "bo": bo}


def rnn_hidden_character_2_seq(kparams, category, x_seq, hidden0, *, output_size,
                               max_time_chunk=128):
    """Run the RNN cell over a whole sequence with one pallas_call.

    x_seq: (T, B, input_size), hidden0: (B, hidden_size).
    Returns (log-softmax outputs (T, B, output_size), final hidden (B, hidden)).
    """
    del category  # unused in forward (matches the reference module)
    wx, bf = kparams["wx"], kparams["bf"]
    wh, woh, woo, bo = kparams["wh"], kparams["woh"], kparams["woo"], kparams["bo"]

    I = wx.shape[0]
    HP = wh.shape[0]
    OP = woo.shape[0]
    O = output_size
    T, B, Ix = x_seq.shape
    H = hidden0.shape[1]
    assert Ix == I and H <= HP and O <= OP
    BP = _round_up(max(B, 8), 8)

    # Time-chunk size: whole sequence per grid step when small; otherwise the
    # largest divisor of T <= max_time_chunk (tail-free), falling back to
    # padding + in-kernel tail mask for awkward (e.g. prime) T.
    # max_time_chunk=128 keeps the double-buffered xproj/out chunks well inside
    # v7x's 64 MiB VMEM even if H/O are scaled up.
    if T <= max_time_chunk:
        TT = T
    else:
        TT = _largest_divisor_leq(T, max_time_chunk)
        if TT < max(1, max_time_chunk // 4):
            TT = max_time_chunk
    num_chunks = pl.cdiv(T, TT)
    T_pad = num_chunks * TT
    mask_tail = T_pad != T

    # Pad batch to 8 sublanes and time to a chunk multiple (amortized over T).
    x_p = jnp.pad(x_seq.astype(jnp.float32),
                  ((0, T_pad - T), (0, BP - B), (0, 0)))
    h0_p = jnp.pad(hidden0.astype(jnp.float32), ((0, BP - B), (0, HP - H)))

    # Non-recurrent input projection hoisted out of the serial path:
    # one (T_pad*BP, I) x (I, HP+OP) matmul with the fused bias folded in.
    xproj = (x_p.reshape(T_pad * BP, I) @ wx + bf).reshape(T_pad, BP, HP + OP)

    flops = 2 * T_pad * BP * (HP * (HP + OP) + HP * OP + OP * OP)
    transcendentals = T_pad * BP * (OP + 1)
    bytes_accessed = (2 * (HP * (HP + OP) + HP * OP + OP * OP)     # bf16 weights
                      + 4 * (OP + 2 * BP * HP
                             + T_pad * BP * (HP + 2 * OP)))

    kernel = functools.partial(_rnn_chunk_kernel, hp=HP, tt=TT,
                               t_valid=T, mask_tail=mask_tail)

    out_p, h_final_p = pl.pallas_call(
        kernel,
        out_shape=(jax.ShapeDtypeStruct((T_pad, BP, OP), jnp.float32),
                   jax.ShapeDtypeStruct((BP, HP), jnp.float32)),
        grid=(num_chunks,),
        in_specs=[
            pl.BlockSpec((BP, HP), lambda c: (0, 0)),              # h0     (resident)
            pl.BlockSpec((TT, BP, HP + OP), lambda c: (c, 0, 0)),  # xproj  (per chunk)
            pl.BlockSpec((HP, HP + OP), lambda c: (0, 0)),         # wh     (resident)
            pl.BlockSpec((HP, OP), lambda c: (0, 0)),              # woh    (resident)
            pl.BlockSpec((OP, OP), lambda c: (0, 0)),              # woo    (resident)
            pl.BlockSpec((1, OP), lambda c: (0, 0)),               # bo     (resident)
        ],
        out_specs=(pl.BlockSpec((TT, BP, OP), lambda c: (c, 0, 0)),
                   pl.BlockSpec((BP, HP), lambda c: (0, 0))),
        input_output_aliases={0: 1},   # reuse padded-h0 HBM buffer for final hidden
        cost_estimate=pl.CostEstimate(flops=flops,
                                      transcendentals=transcendentals,
                                      bytes_accessed=bytes_accessed),
        compiler_params=pltpu.CompilerParams(
            dimension_semantics=("arbitrary",)),   # time axis is a recurrence
    )(h0_p, xproj, wh, woh, woo, bo)

    return out_p[:T, :B, :O], h_final_p[:B, :H]


def rnn_hidden_character_2(kparams, category, x, hidden, *, output_size):
    """Single-step forward matching the original module's signature."""
    out_seq, h_final = rnn_hidden_character_2_seq(
        kparams, category, x[None], hidden, output_size=output_size)
    return out_seq[0], h_final


def _reference_seq(params, x_seq, h0):
    def step(h, x):
        comb = jnp.concatenate([x, h], axis=1)
        h_new = comb @ params["w_i2h"].T + params["b_i2h"]
        o1 = comb @ params["w_i2o"].T + params["b_i2o"]
        o2 = (jnp.concatenate([h_new, o1], axis=1) @ params["w_o2o"].T
              + params["b_o2o"])
        return h_new, jax.nn.log_softmax(o2, axis=1)

    h_final, outs = jax.lax.scan(step, h0, x_seq)
    return outs, h_final


if __name__ == "__main__":
    key = jax.random.PRNGKey(0)
    B, I, H, O, T = 2, 8, 32, 16, 8  # batch, input, hidden, output, seq-len

    keys = jax.random.split(key, 10)
    params = {
        "w_i2h": jax.random.normal(keys[0], (H, I + H), jnp.float32) * 0.1,
        "b_i2h": jax.random.normal(keys[1], (H,), jnp.float32) * 0.1,
        "w_i2o": jax.random.normal(keys[2], (O, I + H), jnp.float32) * 0.1,
        "b_i2o": jax.random.normal(keys[3], (O,), jnp.float32) * 0.1,
        "w_o2o": jax.random.normal(keys[4], (O, H + O), jnp.float32) * 0.1,
        "b_o2o": jax.random.normal(keys[5], (O,), jnp.float32) * 0.1,
    }

    # One-time weight re-layout / bf16 cast, outside the jitted forward.
    kparams = prepare_params(params, I, H, O)

    category = jax.random.normal(keys[6], (B, 4), jnp.float32)  # unused in forward
    x_seq = jax.random.normal(keys[7], (T, B, I), jnp.float32)
    hidden0 = jax.random.normal(keys[8], (B, H), jnp.float32)

    fwd_seq = jax.jit(functools.partial(rnn_hidden_character_2_seq, output_size=O))
    out_seq, h_final = fwd_seq(kparams, category, x_seq, hidden0)
    out_seq = jax.block_until_ready(out_seq)
    h_final = jax.block_until_ready(h_final)

    ref_out, ref_hid = _reference_seq(params, x_seq, hidden0)
    assert out_seq.shape == (T, B, O) and h_final.shape == (B, H)
    # bf16 recurrent weights (f32 accumulation) => tolerance loosened to 1e-2.
    assert jnp.allclose(out_seq, ref_out, atol=1e-2, rtol=1e-2), \
        float(jnp.max(jnp.abs(out_seq - ref_out)))
    assert jnp.allclose(h_final, ref_hid, atol=1e-2, rtol=1e-2), \
        float(jnp.max(jnp.abs(h_final - ref_hid)))

    # Single-step call (original module forward signature), T=1 path.
    fwd_step = jax.jit(functools.partial(rnn_hidden_character_2, output_size=O))
    out1, hid1 = fwd_step(kparams, category, x_seq[0], hidden0)
    out1 = jax.block_until_ready(out1)
    ref1_out, ref1_hid = _reference_seq(params, x_seq[:1], hidden0)
    assert jnp.allclose(out1, ref1_out[0], atol=1e-2, rtol=1e-2)
    assert jnp.allclose(hid1, ref1_hid, atol=1e-2, rtol=1e-2)

    print("KERNEL_OK")
</pallas_src>

<mosaic_0001>
module attributes {stable_mosaic.version = 11 : i64} {
  func.func @_rnn_chunk_kernel(%arg0: i32, %arg1: memref<8x128xf32, #tpu.memory_space<vmem>>, %arg2: memref<8x8x256xf32, #tpu.memory_space<vmem>>, %arg3: memref<128x256xbf16, #tpu.memory_space<vmem>>, %arg4: memref<128x128xbf16, #tpu.memory_space<vmem>>, %arg5: memref<128x128xbf16, #tpu.memory_space<vmem>>, %arg6: memref<1x128xf32, #tpu.memory_space<vmem>>, %arg7: memref<8x8x128xf32, #tpu.memory_space<vmem>>, %arg8: memref<8x128xf32, #tpu.memory_space<vmem>>) attributes {dimension_semantics = [#tpu.dimension_semantics<arbitrary>], iteration_bounds = array<i64: 1>, scalar_prefetch = 0 : i64, scratch_operands = 0 : i64, tpu.core_type = #tpu.core_type<tc>, window_params = [{pipeline_mode = #tpu.pipeline_mode<synchronous>, transform_indices = @transform_0, window_bounds = array<i64: 8, 128>}, {transform_indices = @transform_1, window_bounds = array<i64: 8, 8, 256>}, {pipeline_mode = #tpu.pipeline_mode<synchronous>, transform_indices = @transform_2, window_bounds = array<i64: 128, 256>}, {pipeline_mode = #tpu.pipeline_mode<synchronous>, transform_indices = @transform_3, window_bounds = array<i64: 128, 128>}, {pipeline_mode = #tpu.pipeline_mode<synchronous>, transform_indices = @transform_4, window_bounds = array<i64: 128, 128>}, {pipeline_mode = #tpu.pipeline_mode<synchronous>, transform_indices = @transform_5, window_bounds = array<i64: 1, 128>}, {transform_indices = @transform_6, window_bounds = array<i64: 8, 8, 128>}, {pipeline_mode = #tpu.pipeline_mode<synchronous>, transform_indices = @transform_7, window_bounds = array<i64: 8, 128>}]} {
    %c0_i32 = arith.constant 0 : i32
    %0 = arith.cmpi eq, %arg0, %c0_i32 : i32
    %1 = arith.extui %0 : i1 to i32
    %c0_i32_0 = arith.constant 0 : i32
    %2 = arith.cmpi ne, %1, %c0_i32_0 : i32
    scf.if %2 {
      %c0_126 = arith.constant 0 : index
      %c0_127 = arith.constant 0 : index
      %256 = vector.load %arg1[%c0_126, %c0_127] : memref<8x128xf32, #tpu.memory_space<vmem>>, vector<8x128xf32>
      %c0_128 = arith.constant 0 : index
      %c0_129 = arith.constant 0 : index
      %257 = vector.load %arg8[%c0_128, %c0_129] : memref<8x128xf32, #tpu.memory_space<vmem>>, vector<8x128xf32>
      tpu.vector_store %arg8[%c0_128, %c0_129], %256 {strides = array<i32>} : memref<8x128xf32, #tpu.memory_space<vmem>>, vector<8x128xf32>,
    } else {
    }
    %c0 = arith.constant 0 : index
    %c0_1 = arith.constant 0 : index
    %3 = vector.load %arg6[%c0, %c0_1] : memref<1x128xf32, #tpu.memory_space<vmem>>, vector<1x128xf32>
    %4 = vector.shape_cast %3 : vector<1x128xf32> to vector<1x128xf32>
    %5 = vector.broadcast %4 : vector<1x128xf32> to vector<8x128xf32>
    %c0_2 = arith.constant 0 : index
    %c0_3 = arith.constant 0 : index
    %6 = vector.load %arg8[%c0_2, %c0_3] : memref<8x128xf32, #tpu.memory_space<vmem>>, vector<8x128xf32>
    %c0_i32_4 = arith.constant 0 : i32
    %7 = arith.index_cast %c0_i32_4 : i32 to index
    %c0_5 = arith.constant 0 : index
    %c0_6 = arith.constant 0 : index
    %8 = vector.load %arg2[%7, %c0_5, %c0_6] : memref<8x8x256xf32, #tpu.memory_space<vmem>>, vector<1x8x256xf32>
    %9 = vector.shape_cast %8 : vector<1x8x256xf32> to vector<8x256xf32>
    %10 = arith.truncf %6 : vector<8x128xf32> to vector<8x128xbf16>
    %c0_7 = arith.constant 0 : index
    %c0_8 = arith.constant 0 : index
    %11 = vector.load %arg3[%c0_7, %c0_8] : memref<128x256xbf16, #tpu.memory_space<vmem>>, vector<128x256xbf16>
    %cst = arith.constant dense<0.000000e+00> : vector<8x256xf32>
    %12 = tpu.matmul %10, %11, %cst {dimension_numbers = #tpu.dot_dimension_numbers<[1], [0], [0], [1], [0, 0, 1, 1], [], []>} : vector<8x128xbf16>, vector<128x256xbf16>, vector<8x256xf32> -> vector<8x256xf32>
    %13 = arith.addf %9, %12 : vector<8x256xf32>
    %14 = vector.extract_strided_slice %13 {offsets = [0, 0], sizes = [8, 128], strides = [1, 1]} : vector<8x256xf32> to vector<8x128xf32>
    %15 = vector.extract_strided_slice %13 {offsets = [0, 128], sizes = [8, 128], strides = [1, 1]} : vector<8x256xf32> to vector<8x128xf32>
    %16 = arith.truncf %14 : vector<8x128xf32> to vector<8x128xbf16>
    %c0_9 = arith.constant 0 : index
    %c0_10 = arith.constant 0 : index
    %17 = vector.load %arg4[%c0_9, %c0_10] : memref<128x128xbf16, #tpu.memory_space<vmem>>, vector<128x128xbf16>
    %cst_11 = arith.constant dense<0.000000e+00> : vector<8x128xf32>
    %18 = tpu.matmul %16, %17, %cst_11 {dimension_numbers = #tpu.dot_dimension_numbers<[1], [0], [0], [1], [0, 0, 1, 1], [], []>} : vector<8x128xbf16>, vector<128x128xbf16>, vector<8x128xf32> -> vector<8x128xf32>
    %19 = arith.truncf %15 : vector<8x128xf32> to vector<8x128xbf16>
    %c0_12 = arith.constant 0 : index
    %c0_13 = arith.constant 0 : index
    %20 = vector.load %arg5[%c0_12, %c0_13] : memref<128x128xbf16, #tpu.memory_space<vmem>>, vector<128x128xbf16>
    %cst_14 = arith.constant dense<0.000000e+00> : vector<8x128xf32>
    %21 = tpu.matmul %19, %20, %cst_14 {dimension_numbers = #tpu.dot_dimension_numbers<[1], [0], [0], [1], [0, 0, 1, 1], [], []>} : vector<8x128xbf16>, vector<128x128xbf16>, vector<8x128xf32> -> vector<8x128xf32>
    %22 = arith.addf %18, %21 : vector<8x128xf32>
    %23 = arith.addf %22, %5 : vector<8x128xf32>
    %cst_15 = arith.constant dense<0xFF800000> : vector<8xf32>
    %24 = vector.multi_reduction <maximumf>, %23, %cst_15 [1] : vector<8x128xf32> to vector<8xf32>
    %25 = vector.shape_cast %24 : vector<8xf32> to vector<8x1xf32>
    %26 = vector.broadcast %25 : vector<8x1xf32> to vector<8x128xf32>
    %27 = arith.subf %23, %26 : vector<8x128xf32>
    %28 = math.exp %27 : vector<8x128xf32>
    %cst_16 = arith.constant dense<0.000000e+00> : vector<8xf32>
    %29 = vector.multi_reduction <add>, %28, %cst_16 [1] : vector<8x128xf32> to vector<8xf32>
    %30 = vector.shape_cast %29 : vector<8xf32> to vector<8x1xf32>
    %31 = math.log %30 : vector<8x1xf32>
    %32 = vector.broadcast %31 : vector<8x1xf32> to vector<8x128xf32>
    %33 = arith.subf %27, %32 : vector<8x128xf32>
    %34 = arith.index_cast %c0_i32_4 : i32 to index
    %c0_17 = arith.constant 0 : index
    %c0_18 = arith.constant 0 : index
    %35 = vector.load %arg7[%34, %c0_17, %c0_18] : memref<8x8x128xf32, #tpu.memory_space<vmem>>, vector<1x8x128xf32>
    %36 = vector.shape_cast %35 : vector<1x8x128xf32> to vector<8x128xf32>
    %37 = vector.shape_cast %33 : vector<8x128xf32> to vector<1x8x128xf32>
    tpu.vector_store %arg7[%34, %c0_17, %c0_18], %37 {strides = array<i32>} : memref<8x8x128xf32, #tpu.memory_space<vmem>>, vector<1x8x128xf32>,
    %c1_i32 = arith.constant 1 : i32
    %38 = arith.index_cast %c1_i32 : i32 to index
    %c0_19 = arith.constant 0 : index
    %c0_20 = arith.constant 0 : index
    %39 = vector.load %arg2[%38, %c0_19, %c0_20] : memref<8x8x256xf32, #tpu.memory_space<vmem>>, vector<1x8x256xf32>
    %40 = vector.shape_cast %39 : vector<1x8x256xf32> to vector<8x256xf32>
    %41 = arith.truncf %14 : vector<8x128xf32> to vector<8x128xbf16>
    %c0_21 = arith.constant 0 : index
    %c0_22 = arith.constant 0 : index
    %42 = vector.load %arg3[%c0_21, %c0_22] : memref<128x256xbf16, #tpu.memory_space<vmem>>, vector<128x256xbf16>
    %cst_23 = arith.constant dense<0.000000e+00> : vector<8x256xf32>
    %43 = tpu.matmul %41, %42, %cst_23 {dimension_numbers = #tpu.dot_dimension_numbers<[1], [0], [0], [1], [0, 0, 1, 1], [], []>} : vector<8x128xbf16>, vector<128x256xbf16>, vector<8x256xf32> -> vector<8x256xf32>
    %44 = arith.addf %40, %43 : vector<8x256xf32>
    %45 = vector.extract_strided_slice %44 {offsets = [0, 0], sizes = [8, 128], strides = [1, 1]} : vector<8x256xf32> to vector<8x128xf32>
    %46 = vector.extract_strided_slice %44 {offsets = [0, 128], sizes = [8, 128], strides = [1, 1]} : vector<8x256xf32> to vector<8x128xf32>
    %47 = arith.truncf %45 : vector<8x128xf32> to vector<8x128xbf16>
    %c0_24 = arith.constant 0 : index
    %c0_25 = arith.constant 0 : index
    %48 = vector.load %arg4[%c0_24, %c0_25] : memref<128x128xbf16, #tpu.memory_space<vmem>>, vector<128x128xbf16>
    %cst_26 = arith.constant dense<0.000000e+00> : vector<8x128xf32>
    %49 = tpu.matmul %47, %48, %cst_26 {dimension_numbers = #tpu.dot_dimension_numbers<[1], [0], [0], [1], [0, 0, 1, 1], [], []>} : vector<8x128xbf16>, vector<128x128xbf16>, vector<8x128xf32> -> vector<8x128xf32>
    %50 = arith.truncf %46 : vector<8x128xf32> to vector<8x128xbf16>
    %c0_27 = arith.constant 0 : index
    %c0_28 = arith.constant 0 : index
    %51 = vector.load %arg5[%c0_27, %c0_28] : memref<128x128xbf16, #tpu.memory_space<vmem>>, vector<128x128xbf16>
    %cst_29 = arith.constant dense<0.000000e+00> : vector<8x128xf32>
    %52 = tpu.matmul %50, %51, %cst_29 {dimension_numbers = #tpu.dot_dimension_numbers<[1], [0], [0], [1], [0, 0, 1, 1], [], []>} : vector<8x128xbf16>, vector<128x128xbf16>, vector<8x128xf32> -> vector<8x128xf32>
    %53 = arith.addf %49, %52 : vector<8x128xf32>
    %54 = arith.addf %53, %5 : vector<8x128xf32>
    %cst_30 = arith.constant dense<0xFF800000> : vector<8xf32>
    %55 = vector.multi_reduction <maximumf>, %54, %cst_30 [1] : vector<8x128xf32> to vector<8xf32>
    %56 = vector.shape_cast %55 : vector<8xf32> to vector<8x1xf32>
    %57 = vector.broadcast %56 : vector<8x1xf32> to vector<8x128xf32>
    %58 = arith.subf %54, %57 : vector<8x128xf32>
    %59 = math.exp %58 : vector<8x128xf32>
    %cst_31 = arith.constant dense<0.000000e+00> : vector<8xf32>
    %60 = vector.multi_reduction <add>, %59, %cst_31 [1] : vector<8x128xf32> to vector<8xf32>
    %61 = vector.shape_cast %60 : vector<8xf32> to vector<8x1xf32>
    %62 = math.log %61 : vector<8x1xf32>
    %63 = vector.broadcast %62 : vector<8x1xf32> to vector<8x128xf32>
    %64 = arith.subf %58, %63 : vector<8x128xf32>
    %65 = arith.index_cast %c1_i32 : i32 to index
    %c0_32 = arith.constant 0 : index
    %c0_33 = arith.constant 0 : index
    %66 = vector.load %arg7[%65, %c0_32, %c0_33] : memref<8x8x128xf32, #tpu.memory_space<vmem>>, vector<1x8x128xf32>
    %67 = vector.shape_cast %66 : vector<1x8x128xf32> to vector<8x128xf32>
    %68 = vector.shape_cast %64 : vector<8x128xf32> to vector<1x8x128xf32>
    tpu.vector_store %arg7[%65, %c0_32, %c0_33], %68 {strides = array<i32>} : memref<8x8x128xf32, #tpu.memory_space<vmem>>, vector<1x8x128xf32>,
    %c2_i32 = arith.constant 2 : i32
    %69 = arith.index_cast %c2_i32 : i32 to index
    %c0_34 = arith.constant 0 : index
    %c0_35 = arith.constant 0 : index
    %70 = vector.load %arg2[%69, %c0_34, %c0_35] : memref<8x8x256xf32, #tpu.memory_space<vmem>>, vector<1x8x256xf32>
    %71 = vector.shape_cast %70 : vector<1x8x256xf32> to vector<8x256xf32>
    %72 = arith.truncf %45 : vector<8x128xf32> to vector<8x128xbf16>
    %c0_36 = arith.constant 0 : index
    %c0_37 = arith.constant 0 : index
    %73 = vector.load %arg3[%c0_36, %c0_37] : memref<128x256xbf16, #tpu.memory_space<vmem>>, vector<128x256xbf16>
    %cst_38 = arith.constant dense<0.000000e+00> : vector<8x256xf32>
    %74 = tpu.matmul %72, %73, %cst_38 {dimension_numbers = #tpu.dot_dimension_numbers<[1], [0], [0], [1], [0, 0, 1, 1], [], []>} : vector<8x128xbf16>, vector<128x256xbf16>, vector<8x256xf32> -> vector<8x256xf32>
    %75 = arith.addf %71, %74 : vector<8x256xf32>
    %76 = vector.extract_strided_slice %75 {offsets = [0, 0], sizes = [8, 128], strides = [1, 1]} : vector<8x256xf32> to vector<8x128xf32>
    %77 = vector.extract_strided_slice %75 {offsets = [0, 128], sizes = [8, 128], strides = [1, 1]} : vector<8x256xf32> to vector<8x128xf32>
    %78 = arith.truncf %76 : vector<8x128xf32> to vector<8x128xbf16>
    %c0_39 = arith.constant 0 : index
    %c0_40 = arith.constant 0 : index
    %79 = vector.load %arg4[%c0_39, %c0_40] : memref<128x128xbf16, #tpu.memory_space<vmem>>, vector<128x128xbf16>
    %cst_41 = arith.constant dense<0.000000e+00> : vector<8x128xf32>
    %80 = tpu.matmul %78, %79, %cst_41 {dimension_numbers = #tpu.dot_dimension_numbers<[1], [0], [0], [1], [0, 0, 1, 1], [], []>} : vector<8x128xbf16>, vector<128x128xbf16>, vector<8x128xf32> -> vector<8x128xf32>
    %81 = arith.truncf %77 : vector<8x128xf32> to vector<8x128xbf16>
    %c0_42 = arith.constant 0 : index
    %c0_43 = arith.constant 0 : index
    %82 = vector.load %arg5[%c0_42, %c0_43] : memref<128x128xbf16, #tpu.memory_space<vmem>>, vector<128x128xbf16>
    %cst_44 = arith.constant dense<0.000000e+00> : vector<8x128xf32>
    %83 = tpu.matmul %81, %82, %cst_44 {dimension_numbers = #tpu.dot_dimension_numbers<[1], [0], [0], [1], [0, 0, 1, 1], [], []>} : vector<8x128xbf16>, vector<128x128xbf16>, vector<8x128xf32> -> vector<8x128xf32>
    %84 = arith.addf %80, %83 : vector<8x128xf32>
    %85 = arith.addf %84, %5 : vector<8x128xf32>
    %cst_45 = arith.constant dense<0xFF800000> : vector<8xf32>
    %86 = vector.multi_reduction <maximumf>, %85, %cst_45 [1] : vector<8x128xf32> to vector<8xf32>
    %87 = vector.shape_cast %86 : vector<8xf32> to vector<8x1xf32>
    %88 = vector.broadcast %87 : vector<8x1xf32> to vector<8x128xf32>
    %89 = arith.subf %85, %88 : vector<8x128xf32>
    %90 = math.exp %89 : vector<8x128xf32>
    %cst_46 = arith.constant dense<0.000000e+00> : vector<8xf32>
    %91 = vector.multi_reduction <add>, %90, %cst_46 [1] : vector<8x128xf32> to vector<8xf32>
    %92 = vector.shape_cast %91 : vector<8xf32> to vector<8x1xf32>
    %93 = math.log %92 : vector<8x1xf32>
    %94 = vector.broadcast %93 : vector<8x1xf32> to vector<8x128xf32>
    %95 = arith.subf %89, %94 : vector<8x128xf32>
    %96 = arith.index_cast %c2_i32 : i32 to index
    %c0_47 = arith.constant 0 : index
    %c0_48 = arith.constant 0 : index
    %97 = vector.load %arg7[%96, %c0_47, %c0_48] : memref<8x8x128xf32, #tpu.memory_space<vmem>>, vector<1x8x128xf32>
    %98 = vector.shape_cast %97 : vector<1x8x128xf32> to vector<8x128xf32>
    %99 = vector.shape_cast %95 : vector<8x128xf32> to vector<1x8x128xf32>
    tpu.vector_store %arg7[%96, %c0_47, %c0_48], %99 {strides = array<i32>} : memref<8x8x128xf32, #tpu.memory_space<vmem>>, vector<1x8x128xf32>,
    %c3_i32 = arith.constant 3 : i32
    %100 = arith.index_cast %c3_i32 : i32 to index
    %c0_49 = arith.constant 0 : index
    %c0_50 = arith.constant 0 : index
    %101 = vector.load %arg2[%100, %c0_49, %c0_50] : memref<8x8x256xf32, #tpu.memory_space<vmem>>, vector<1x8x256xf32>
    %102 = vector.shape_cast %101 : vector<1x8x256xf32> to vector<8x256xf32>
    %103 = arith.truncf %76 : vector<8x128xf32> to vector<8x128xbf16>
    %c0_51 = arith.constant 0 : index
    %c0_52 = arith.constant 0 : index
    %104 = vector.load %arg3[%c0_51, %c0_52] : memref<128x256xbf16, #tpu.memory_space<vmem>>, vector<128x256xbf16>
    %cst_53 = arith.constant dense<0.000000e+00> : vector<8x256xf32>
    %105 = tpu.matmul %103, %104, %cst_53 {dimension_numbers = #tpu.dot_dimension_numbers<[1], [0], [0], [1], [0, 0, 1, 1], [], []>} : vector<8x128xbf16>, vector<128x256xbf16>, vector<8x256xf32> -> vector<8x256xf32>
    %106 = arith.addf %102, %105 : vector<8x256xf32>
    %107 = vector.extract_strided_slice %106 {offsets = [0, 0], sizes = [8, 128], strides = [1, 1]} : vector<8x256xf32> to vector<8x128xf32>
    %108 = vector.extract_strided_slice %106 {offsets = [0, 128], sizes = [8, 128], strides = [1, 1]} : vector<8x256xf32> to vector<8x128xf32>
    %109 = arith.truncf %107 : vector<8x128xf32> to vector<8x128xbf16>
    %c0_54 = arith.constant 0 : index
    %c0_55 = arith.constant 0 : index
    %110 = vector.load %arg4[%c0_54, %c0_55] : memref<128x128xbf16, #tpu.memory_space<vmem>>, vector<128x128xbf16>
    %cst_56 = arith.constant dense<0.000000e+00> : vector<8x128xf32>
    %111 = tpu.matmul %109, %110, %cst_56 {dimension_numbers = #tpu.dot_dimension_numbers<[1], [0], [0], [1], [0, 0, 1, 1], [], []>} : vector<8x128xbf16>, vector<128x128xbf16>, vector<8x128xf32> -> vector<8x128xf32>
    %112 = arith.truncf %108 : vector<8x128xf32> to vector<8x128xbf16>
    %c0_57 = arith.constant 0 : index
    %c0_58 = arith.constant 0 : index
    %113 = vector.load %arg5[%c0_57, %c0_58] : memref<128x128xbf16, #tpu.memory_space<vmem>>, vector<128x128xbf16>
    %cst_59 = arith.constant dense<0.000000e+00> : vector<8x128xf32>
    %114 = tpu.matmul %112, %113, %cst_59 {dimension_numbers = #tpu.dot_dimension_numbers<[1], [0], [0], [1], [0, 0, 1, 1], [], []>} : vector<8x128xbf16>, vector<128x128xbf16>, vector<8x128xf32> -> vector<8x128xf32>
    %115 = arith.addf %111, %114 : vector<8x128xf32>
    %116 = arith.addf %115, %5 : vector<8x128xf32>
    %cst_60 = arith.constant dense<0xFF800000> : vector<8xf32>
    %117 = vector.multi_reduction <maximumf>, %116, %cst_60 [1] : vector<8x128xf32> to vector<8xf32>
    %118 = vector.shape_cast %117 : vector<8xf32> to vector<8x1xf32>
    %119 = vector.broadcast %118 : vector<8x1xf32> to vector<8x128xf32>
    %120 = arith.subf %116, %119 : vector<8x128xf32>
    %121 = math.exp %120 : vector<8x128xf32>
    %cst_61 = arith.constant dense<0.000000e+00> : vector<8xf32>
    %122 = vector.multi_reduction <add>, %121, %cst_61 [1] : vector<8x128xf32> to vector<8xf32>
    %123 = vector.shape_cast %122 : vector<8xf32> to vector<8x1xf32>
    %124 = math.log %123 : vector<8x1xf32>
    %125 = vector.broadcast %124 : vector<8x1xf32> to vector<8x128xf32>
    %126 = arith.subf %120, %125 : vector<8x128xf32>
    %127 = arith.index_cast %c3_i32 : i32 to index
    %c0_62 = arith.constant 0 : index
    %c0_63 = arith.constant 0 : index
    %128 = vector.load %arg7[%127, %c0_62, %c0_63] : memref<8x8x128xf32, #tpu.memory_space<vmem>>, vector<1x8x128xf32>
    %129 = vector.shape_cast %128 : vector<1x8x128xf32> to vector<8x128xf32>
    %130 = vector.shape_cast %126 : vector<8x128xf32> to vector<1x8x128xf32>
    tpu.vector_store %arg7[%127, %c0_62, %c0_63], %130 {strides = array<i32>} : memref<8x8x128xf32, #tpu.memory_space<vmem>>, vector<1x8x128xf32>,
    %c4_i32 = arith.constant 4 : i32
    %131 = arith.index_cast %c4_i32 : i32 to index
    %c0_64 = arith.constant 0 : index
    %c0_65 = arith.constant 0 : index
    %132 = vector.load %arg2[%131, %c0_64, %c0_65] : memref<8x8x256xf32, #tpu.memory_space<vmem>>, vector<1x8x256xf32>
    %133 = vector.shape_cast %132 : vector<1x8x256xf32> to vector<8x256xf32>
    %134 = arith.truncf %107 : vector<8x128xf32> to vector<8x128xbf16>
    %c0_66 = arith.constant 0 : index
    %c0_67 = arith.constant 0 : index
    %135 = vector.load %arg3[%c0_66, %c0_67] : memref<128x256xbf16, #tpu.memory_space<vmem>>, vector<128x256xbf16>
    %cst_68 = arith.constant dense<0.000000e+00> : vector<8x256xf32>
    %136 = tpu.matmul %134, %135, %cst_68 {dimension_numbers = #tpu.dot_dimension_numbers<[1], [0], [0], [1], [0, 0, 1, 1], [], []>} : vector<8x128xbf16>, vector<128x256xbf16>, vector<8x256xf32> -> vector<8x256xf32>
    %137 = arith.addf %133, %136 : vector<8x256xf32>
    %138 = vector.extract_strided_slice %137 {offsets = [0, 0], sizes = [8, 128], strides = [1, 1]} : vector<8x256xf32> to vector<8x128xf32>
    %139 = vector.extract_strided_slice %137 {offsets = [0, 128], sizes = [8, 128], strides = [1, 1]} : vector<8x256xf32> to vector<8x128xf32>
    %140 = arith.truncf %138 : vector<8x128xf32> to vector<8x128xbf16>
    %c0_69 = arith.constant 0 : index
    %c0_70 = arith.constant 0 : index
    %141 = vector.load %arg4[%c0_69, %c0_70] : memref<128x128xbf16, #tpu.memory_space<vmem>>, vector<128x128xbf16>
    %cst_71 = arith.constant dense<0.000000e+00> : vector<8x128xf32>
    %142 = tpu.matmul %140, %141, %cst_71 {dimension_numbers = #tpu.dot_dimension_numbers<[1], [0], [0], [1], [0, 0, 1, 1], [], []>} : vector<8x128xbf16>, vector<128x128xbf16>, vector<8x128xf32> -> vector<8x128xf32>
    %143 = arith.truncf %139 : vector<8x128xf32> to vector<8x128xbf16>
    %c0_72 = arith.constant 0 : index
    %c0_73 = arith.constant 0 : index
    %144 = vector.load %arg5[%c0_72, %c0_73] : memref<128x128xbf16, #tpu.memory_space<vmem>>, vector<128x128xbf16>
    %cst_74 = arith.constant dense<0.000000e+00> : vector<8x128xf32>
    %145 = tpu.matmul %143, %144, %cst_74 {dimension_numbers = #tpu.dot_dimension_numbers<[1], [0], [0], [1], [0, 0, 1, 1], [], []>} : vector<8x128xbf16>, vector<128x128xbf16>, vector<8x128xf32> -> vector<8x128xf32>
    %146 = arith.addf %142, %145 : vector<8x128xf32>
    %147 = arith.addf %146, %5 : vector<8x128xf32>
    %cst_75 = arith.constant dense<0xFF800000> : vector<8xf32>
    %148 = vector.multi_reduction <maximumf>, %147, %cst_75 [1] : vector<8x128xf32> to vector<8xf32>
    %149 = vector.shape_cast %148 : vector<8xf32> to vector<8x1xf32>
    %150 = vector.broadcast %149 : vector<8x1xf32> to vector<8x128xf32>
    %151 = arith.subf %147, %150 : vector<8x128xf32>
    %152 = math.exp %151 : vector<8x128xf32>
    %cst_76 = arith.constant dense<0.000000e+00> : vector<8xf32>
    %153 = vector.multi_reduction <add>, %152, %cst_76 [1] : vector<8x128xf32> to vector<8xf32>
    %154 = vector.shape_cast %153 : vector<8xf32> to vector<8x1xf32>
    %155 = math.log %154 : vector<8x1xf32>
    %156 = vector.broadcast %155 : vector<8x1xf32> to vector<8x128xf32>
    %157 = arith.subf %151, %156 : vector<8x128xf32>
    %158 = arith.index_cast %c4_i32 : i32 to index
    %c0_77 = arith.constant 0 : index
    %c0_78 = arith.constant 0 : index
    %159 = vector.load %arg7[%158, %c0_77, %c0_78] : memref<8x8x128xf32, #tpu.memory_space<vmem>>, vector<1x8x128xf32>
    %160 = vector.shape_cast %159 : vector<1x8x128xf32> to vector<8x128xf32>
    %161 = vector.shape_cast %157 : vector<8x128xf32> to vector<1x8x128xf32>
    tpu.vector_store %arg7[%158, %c0_77, %c0_78], %161 {strides = array<i32>} : memref<8x8x128xf32, #tpu.memory_space<vmem>>, vector<1x8x128xf32>,
    %c5_i32 = arith.constant 5 : i32
    %162 = arith.index_cast %c5_i32 : i32 to index
    %c0_79 = arith.constant 0 : index
    %c0_80 = arith.constant 0 : index
    %163 = vector.load %arg2[%162, %c0_79, %c0_80] : memref<8x8x256xf32, #tpu.memory_space<vmem>>, vector<1x8x256xf32>
    %164 = vector.shape_cast %163 : vector<1x8x256xf32> to vector<8x256xf32>
    %165 = arith.truncf %138 : vector<8x128xf32> to vector<8x128xbf16>
    %c0_81 = arith.constant 0 : index
    %c0_82 = arith.constant 0 : index
    %166 = vector.load %arg3[%c0_81, %c0_82] : memref<128x256xbf16, #tpu.memory_space<vmem>>, vector<128x256xbf16>
    %cst_83 = arith.constant dense<0.000000e+00> : vector<8x256xf32>
    %167 = tpu.matmul %165, %166, %cst_83 {dimension_numbers = #tpu.dot_dimension_numbers<[1], [0], [0], [1], [0, 0, 1, 1], [], []>} : vector<8x128xbf16>, vector<128x256xbf16>, vector<8x256xf32> -> vector<8x256xf32>
    %168 = arith.addf %164, %167 : vector<8x256xf32>
    %169 = vector.extract_strided_slice %168 {offsets = [0, 0], sizes = [8, 128], strides = [1, 1]} : vector<8x256xf32> to vector<8x128xf32>
    %170 = vector.extract_strided_slice %168 {offsets = [0, 128], sizes = [8, 128], strides = [1, 1]} : vector<8x256xf32> to vector<8x128xf32>
    %171 = arith.truncf %169 : vector<8x128xf32> to vector<8x128xbf16>
    %c0_84 = arith.constant 0 : index
    %c0_85 = arith.constant 0 : index
    %172 = vector.load %arg4[%c0_84, %c0_85] : memref<128x128xbf16, #tpu.memory_space<vmem>>, vector<128x128xbf16>
    %cst_86 = arith.constant dense<0.000000e+00> : vector<8x128xf32>
    %173 = tpu.matmul %171, %172, %cst_86 {dimension_numbers = #tpu.dot_dimension_numbers<[1], [0], [0], [1], [0, 0, 1, 1], [], []>} : vector<8x128xbf16>, vector<128x128xbf16>, vector<8x128xf32> -> vector<8x128xf32>
    %174 = arith.truncf %170 : vector<8x128xf32> to vector<8x128xbf16>
    %c0_87 = arith.constant 0 : index
    %c0_88 = arith.constant 0 : index
    %175 = vector.load %arg5[%c0_87, %c0_88] : memref<128x128xbf16, #tpu.memory_space<vmem>>, vector<128x128xbf16>
    %cst_89 = arith.constant dense<0.000000e+00> : vector<8x128xf32>
    %176 = tpu.matmul %174, %175, %cst_89 {dimension_numbers = #tpu.dot_dimension_numbers<[1], [0], [0], [1], [0, 0, 1, 1], [], []>} : vector<8x128xbf16>, vector<128x128xbf16>, vector<8x128xf32> -> vector<8x128xf32>
    %177 = arith.addf %173, %176 : vector<8x128xf32>
    %178 = arith.addf %177, %5 : vector<8x128xf32>
    %cst_90 = arith.constant dense<0xFF800000> : vector<8xf32>
    %179 = vector.multi_reduction <maximumf>, %178, %cst_90 [1] : vector<8x128xf32> to vector<8xf32>
    %180 = vector.shape_cast %179 : vector<8xf32> to vector<8x1xf32>
    %181 = vector.broadcast %180 : vector<8x1xf32> to vector<8x128xf32>
    %182 = arith.subf %178, %181 : vector<8x128xf32>
    %183 = math.exp %182 : vector<8x128xf32>
    %cst_91 = arith.constant dense<0.000000e+00> : vector<8xf32>
    %184 = vector.multi_reduction <add>, %183, %cst_91 [1] : vector<8x128xf32> to vector<8xf32>
    %185 = vector.shape_cast %184 : vector<8xf32> to vector<8x1xf32>
    %186 = math.log %185 : vector<8x1xf32>
    %187 = vector.broadcast %186 : vector<8x1xf32> to vector<8x128xf32>
    %188 = arith.subf %182, %187 : vector<8x128xf32>
    %189 = arith.index_cast %c5_i32 : i32 to index
    %c0_92 = arith.constant 0 : index
    %c0_93 = arith.constant 0 : index
    %190 = vector.load %arg7[%189, %c0_92, %c0_93] : memref<8x8x128xf32, #tpu.memory_space<vmem>>, vector<1x8x128xf32>
    %191 = vector.shape_cast %190 : vector<1x8x128xf32> to vector<8x128xf32>
    %192 = vector.shape_cast %188 : vector<8x128xf32> to vector<1x8x128xf32>
    tpu.vector_store %arg7[%189, %c0_92, %c0_93], %192 {strides = array<i32>} : memref<8x8x128xf32, #tpu.memory_space<vmem>>, vector<1x8x128xf32>,
    %c6_i32 = arith.constant 6 : i32
    %193 = arith.index_cast %c6_i32 : i32 to index
    %c0_94 = arith.constant 0 : index
    %c0_95 = arith.constant 0 : index
    %194 = vector.load %arg2[%193, %c0_94, %c0_95] : memref<8x8x256xf32, #tpu.memory_space<vmem>>, vector<1x8x256xf32>
    %195 = vector.shape_cast %194 : vector<1x8x256xf32> to vector<8x256xf32>
    %196 = arith.truncf %169 : vector<8x128xf32> to vector<8x128xbf16>
    %c0_96 = arith.constant 0 : index
    %c0_97 = arith.constant 0 : index
    %197 = vector.load %arg3[%c0_96, %c0_97] : memref<128x256xbf16, #tpu.memory_space<vmem>>, vector<128x256xbf16>
    %cst_98 = arith.constant dense<0.000000e+00> : vector<8x256xf32>
    %198 = tpu.matmul %196, %197, %cst_98 {dimension_numbers = #tpu.dot_dimension_numbers<[1], [0], [0], [1], [0, 0, 1, 1], [], []>} : vector<8x128xbf16>, vector<128x256xbf16>, vector<8x256xf32> -> vector<8x256xf32>
    %199 = arith.addf %195, %198 : vector<8x256xf32>
    %200 = vector.extract_strided_slice %199 {offsets = [0, 0], sizes = [8, 128], strides = [1, 1]} : vector<8x256xf32> to vector<8x128xf32>
    %201 = vector.extract_strided_slice %199 {offsets = [0, 128], sizes = [8, 128], strides = [1, 1]} : vector<8x256xf32> to vector<8x128xf32>
    %202 = arith.truncf %200 : vector<8x128xf32> to vector<8x128xbf16>
    %c0_99 = arith.constant 0 : index
    %c0_100 = arith.constant 0 : index
    %203 = vector.load %arg4[%c0_99, %c0_100] : memref<128x128xbf16, #tpu.memory_space<vmem>>, vector<128x128xbf16>
    %cst_101 = arith.constant dense<0.000000e+00> : vector<8x128xf32>
    %204 = tpu.matmul %202, %203, %cst_101 {dimension_numbers = #tpu.dot_dimension_numbers<[1], [0], [0], [1], [0, 0, 1, 1], [], []>} : vector<8x128xbf16>, vector<128x128xbf16>, vector<8x128xf32> -> vector<8x128xf32>
    %205 = arith.truncf %201 : vector<8x128xf32> to vector<8x128xbf16>
    %c0_102 = arith.constant 0 : index
    %c0_103 = arith.constant 0 : index
    %206 = vector.load %arg5[%c0_102, %c0_103] : memref<128x128xbf16, #tpu.memory_space<vmem>>, vector<128x128xbf16>
    %cst_104 = arith.constant dense<0.000000e+00> : vector<8x128xf32>
    %207 = tpu.matmul %205, %206, %cst_104 {dimension_numbers = #tpu.dot_dimension_numbers<[1], [0], [0], [1], [0, 0, 1, 1], [], []>} : vector<8x128xbf16>, vector<128x128xbf16>, vector<8x128xf32> -> vector<8x128xf32>
    %208 = arith.addf %204, %207 : vector<8x128xf32>
    %209 = arith.addf %208, %5 : vector<8x128xf32>
    %cst_105 = arith.constant dense<0xFF800000> : vector<8xf32>
    %210 = vector.multi_reduction <maximumf>, %209, %cst_105 [1] : vector<8x128xf32> to vector<8xf32>
    %211 = vector.shape_cast %210 : vector<8xf32> to vector<8x1xf32>
    %212 = vector.broadcast %211 : vector<8x1xf32> to vector<8x128xf32>
    %213 = arith.subf %209, %212 : vector<8x128xf32>
    %214 = math.exp %213 : vector<8x128xf32>
    %cst_106 = arith.constant dense<0.000000e+00> : vector<8xf32>
    %215 = vector.multi_reduction <add>, %214, %cst_106 [1] : vector<8x128xf32> to vector<8xf32>
    %216 = vector.shape_cast %215 : vector<8xf32> to vector<8x1xf32>
    %217 = math.log %216 : vector<8x1xf32>
    %218 = vector.broadcast %217 : vector<8x1xf32> to vector<8x128xf32>
    %219 = arith.subf %213, %218 : vector<8x128xf32>
    %220 = arith.index_cast %c6_i32 : i32 to index
    %c0_107 = arith.constant 0 : index
    %c0_108 = arith.constant 0 : index
    %221 = vector.load %arg7[%220, %c0_107, %c0_108] : memref<8x8x128xf32, #tpu.memory_space<vmem>>, vector<1x8x128xf32>
    %222 = vector.shape_cast %221 : vector<1x8x128xf32> to vector<8x128xf32>
    %223 = vector.shape_cast %219 : vector<8x128xf32> to vector<1x8x128xf32>
    tpu.vector_store %arg7[%220, %c0_107, %c0_108], %223 {strides = array<i32>} : memref<8x8x128xf32, #tpu.memory_space<vmem>>, vector<1x8x128xf32>,
    %c7_i32 = arith.constant 7 : i32
    %224 = arith.index_cast %c7_i32 : i32 to index
    %c0_109 = arith.constant 0 : index
    %c0_110 = arith.constant 0 : index
    %225 = vector.load %arg2[%224, %c0_109, %c0_110] : memref<8x8x256xf32, #tpu.memory_space<vmem>>, vector<1x8x256xf32>
    %226 = vector.shape_cast %225 : vector<1x8x256xf32> to vector<8x256xf32>
    %227 = arith.truncf %200 : vector<8x128xf32> to vector<8x128xbf16>
    %c0_111 = arith.constant 0 : index
    %c0_112 = arith.constant 0 : index
    %228 = vector.load %arg3[%c0_111, %c0_112] : memref<128x256xbf16, #tpu.memory_space<vmem>>, vector<128x256xbf16>
    %cst_113 = arith.constant dense<0.000000e+00> : vector<8x256xf32>
    %229 = tpu.matmul %227, %228, %cst_113 {dimension_numbers = #tpu.dot_dimension_numbers<[1], [0], [0], [1], [0, 0, 1, 1], [], []>} : vector<8x128xbf16>, vector<128x256xbf16>, vector<8x256xf32> -> vector<8x256xf32>
    %230 = arith.addf %226, %229 : vector<8x256xf32>
    %231 = vector.extract_strided_slice %230 {offsets = [0, 0], sizes = [8, 128], strides = [1, 1]} : vector<8x256xf32> to vector<8x128xf32>
    %232 = vector.extract_strided_slice %230 {offsets = [0, 128], sizes = [8, 128], strides = [1, 1]} : vector<8x256xf32> to vector<8x128xf32>
    %233 = arith.truncf %231 : vector<8x128xf32> to vector<8x128xbf16>
    %c0_114 = arith.constant 0 : index
    %c0_115 = arith.constant 0 : index
    %234 = vector.load %arg4[%c0_114, %c0_115] : memref<128x128xbf16, #tpu.memory_space<vmem>>, vector<128x128xbf16>
    %cst_116 = arith.constant dense<0.000000e+00> : vector<8x128xf32>
    %235 = tpu.matmul %233, %234, %cst_116 {dimension_numbers = #tpu.dot_dimension_numbers<[1], [0], [0], [1], [0, 0, 1, 1], [], []>} : vector<8x128xbf16>, vector<128x128xbf16>, vector<8x128xf32> -> vector<8x128xf32>
    %236 = arith.truncf %232 : vector<8x128xf32> to vector<8x128xbf16>
    %c0_117 = arith.constant 0 : index
    %c0_118 = arith.constant 0 : index
    %237 = vector.load %arg5[%c0_117, %c0_118] : memref<128x128xbf16, #tpu.memory_space<vmem>>, vector<128x128xbf16>
    %cst_119 = arith.constant dense<0.000000e+00> : vector<8x128xf32>
    %238 = tpu.matmul %236, %237, %cst_119 {dimension_numbers = #tpu.dot_dimension_numbers<[1], [0], [0], [1], [0, 0, 1, 1], [], []>} : vector<8x128xbf16>, vector<128x128xbf16>, vector<8x128xf32> -> vector<8x128xf32>
    %239 = arith.addf %235, %238 : vector<8x128xf32>
    %240 = arith.addf %239, %5 : vector<8x128xf32>
    %cst_120 = arith.constant dense<0xFF800000> : vector<8xf32>
    %241 = vector.multi_reduction <maximumf>, %240, %cst_120 [1] : vector<8x128xf32> to vector<8xf32>
    %242 = vector.shape_cast %241 : vector<8xf32> to vector<8x1xf32>
    %243 = vector.broadcast %242 : vector<8x1xf32> to vector<8x128xf32>
    %244 = arith.subf %240, %243 : vector<8x128xf32>
    %245 = math.exp %244 : vector<8x128xf32>
    %cst_121 = arith.constant dense<0.000000e+00> : vector<8xf32>
    %246 = vector.multi_reduction <add>, %245, %cst_121 [1] : vector<8x128xf32> to vector<8xf32>
    %247 = vector.shape_cast %246 : vector<8xf32> to vector<8x1xf32>
    %248 = math.log %247 : vector<8x1xf32>
    %249 = vector.broadcast %248 : vector<8x1xf32> to vector<8x128xf32>
    %250 = arith.subf %244, %249 : vector<8x128xf32>
    %251 = arith.index_cast %c7_i32 : i32 to index
    %c0_122 = arith.constant 0 : index
    %c0_123 = arith.constant 0 : index
    %252 = vector.load %arg7[%251, %c0_122, %c0_123] : memref<8x8x128xf32, #tpu.memory_space<vmem>>, vector<1x8x128xf32>
    %253 = vector.shape_cast %252 : vector<1x8x128xf32> to vector<8x128xf32>
    %254 = vector.shape_cast %250 : vector<8x128xf32> to vector<1x8x128xf32>
    tpu.vector_store %arg7[%251, %c0_122, %c0_123], %254 {strides = array<i32>} : memref<8x8x128xf32, #tpu.memory_space<vmem>>, vector<1x8x128xf32>,
    %c8_i32 = arith.constant 8 : i32
    %c0_124 = arith.constant 0 : index
    %c0_125 = arith.constant 0 : index
    %255 = vector.load %arg8[%c0_124, %c0_125] : memref<8x128xf32, #tpu.memory_space<vmem>>, vector<8x128xf32>
    tpu.vector_store %arg8[%c0_124, %c0_125], %231 {strides = array<i32>} : memref<8x128xf32, #tpu.memory_space<vmem>>, vector<8x128xf32>,
    return
  }
  func.func @transform_0(%arg0: i32) -> (i32, i32) {
    %c0_i32 = arith.constant 0 : i32
    %c0_i32_0 = arith.constant 0 : i32
    %c0_i32_1 = arith.constant 0 : i32
    return %c0_i32, %c0_i32_0 : i32, i32
  }
  func.func @transform_1(%arg0: i32) -> (i32, i32, i32) {
    %c0_i32 = arith.constant 0 : i32
    %c0_i32_0 = arith.constant 0 : i32
    %c0_i32_1 = arith.constant 0 : i32
    return %arg0, %c0_i32, %c0_i32_0 : i32, i32, i32
  }
  func.func @transform_2(%arg0: i32) -> (i32, i32) {
    %c0_i32 = arith.constant 0 : i32
    %c0_i32_0 = arith.constant 0 : i32
    %c0_i32_1 = arith.constant 0 : i32
    return %c0_i32, %c0_i32_0 : i32, i32
  }
  func.func @transform_3(%arg0: i32) -> (i32, i32) {
    %c0_i32 = arith.constant 0 : i32
    %c0_i32_0 = arith.constant 0 : i32
    %c0_i32_1 = arith.constant 0 : i32
    return %c0_i32, %c0_i32_0 : i32, i32
  }
  func.func @transform_4(%arg0: i32) -> (i32, i32) {
    %c0_i32 = arith.constant 0 : i32
    %c0_i32_0 = arith.constant 0 : i32
    %c0_i32_1 = arith.constant 0 : i32
    return %c0_i32, %c0_i32_0 : i32, i32
  }
  func.func @transform_5(%arg0: i32) -> (i32, i32) {
    %c0_i32 = arith.constant 0 : i32
    %c0_i32_0 = arith.constant 0 : i32
    %c0_i32_1 = arith.constant 0 : i32
    return %c0_i32, %c0_i32_0 : i32, i32
  }
  func.func @transform_6(%arg0: i32) -> (i32, i32, i32) {
    %c0_i32 = arith.constant 0 : i32
    %c0_i32_0 = arith.constant 0 : i32
    %c0_i32_1 = arith.constant 0 : i32
    return %arg0, %c0_i32, %c0_i32_0 : i32, i32, i32
  }
  func.func @transform_7(%arg0: i32) -> (i32, i32) {
    %c0_i32 = arith.constant 0 : i32
    %c0_i32_0 = arith.constant 0 : i32
    %c0_i32_1 = arith.constant 0 : i32
    return %c0_i32, %c0_i32_0 : i32, i32
  }
}

</mosaic_0001>

<bundles_post_ra>
// kernel: rnn_hidden_character_2_seq.1
= control target key start
LH: loop header
LB: loop body
LE: loop exit
PB: predicated region body
PF: predicated region fallthrough
CT: control target
= control target key end

     0   :  { %13 = vsyncpa [#allocation3], 0  ;;  %s4693_s0 = inlined_call_operand.vmem [shape: f32[8,128], index: 0, kind: input, shape index: {}, may-alias: {0,7}]   ;;  %s4694_s1 = inlined_call_operand.vmem [shape: f32[8,8,256], index: 1, kind: input, shape index: {}]   ;;  %s4695_s2 = inlined_call_operand.vmem [shape: bf16[128,256], index: 2, kind: input, shape index: {}]   ;;  %s4696_s3 = inlined_call_operand.hbm [shape: bf16[128,128], index: 3, kind: input, shape index: {}]   ;;  %s4697_s4 = inlined_call_operand.hbm [shape: bf16[128,128], index: 4, kind: input, shape index: {}]   ;;  %s4698_s5 = inlined_call_operand.vmem [shape: f32[1,128], index: 5, kind: input, shape index: {}]   ;;  %s4699_s6 = inlined_call_operand.vmem [shape: f32[8,8,128], index: 6, kind: output, shape index: {0}]   ;;  %s4700_s7 = inlined_call_operand.vmem [shape: f32[8,128], index: 7, kind: output, shape index: {1}, may-alias: {0,7}]  }
   0x1   :  { %14 = vsyncpa [#allocation5], 0  ;;  %s4017_s24 = smov [#allocation2]   ;;  %s3969_s28 = scalar_lea.hbm %s4696_s3, 1024 }
   0x2   :  { %s26_s25 = sshll.u32 %s4017_s24, 4  ;;  %p3970_p0 = scmp.ne.s32.totalorder %s4696_s3, %s3969_s28  ;;  %s27_s25 = int_to_ptr.vmem [resolvable:$true] %s26_s25 }
   0x3   :  { %p3973_p1 = scmp.lt.u32.totalorder %s3969_s28, %s4696_s3 }
   0x5   :  { %p3975_p2 = pnand %p3973_p1, %p3970_p0 }
   0x7   :  { %3978 = shalt.err (!%p3975_p2)
}
   0x8   :  { %s3979_s10 = scalar_lea.vmem %s27_s25, 1024  ;;  %p3984_p4 = scmp.lt.s32.totalorder %s27_s25, %s27_s25 }
   0x9   :  { %p3980_p3 = scmp.ne.s32.totalorder %s27_s25, %s3979_s10  ;;  %p3985_p5 = scmp.lt.s32.totalorder %s3979_s10, %s3979_s10 }
   0xb   :  { %p3986_p6 = por %p3985_p5, %p3984_p4 }
   0xd   :  { %p3987_p7 = pnand %p3986_p6, %p3980_p3 }
   0xf   :  { %3990 = shalt.err (!%p3987_p7)
}
  0x10   :  { %s4018_s11 = smov 64   ;;  %s4019_s12 = smov 4  }
  0x11   :  { %32 = dma.hbm_to_vmem [thread:$0]  %s4696_s3, 1024, %s27_s25, [#allocation3], %s4018_s11, %s4018_s11, %s4019_s12  }
  0x12   :  { %s4020_s15 = smov [#allocation4]   ;;  %s3991_s19 = scalar_lea.hbm %s4697_s4, 1024 }
  0x13   :  { %s38_s16 = sshll.u32 %s4020_s15, 4  ;;  %p3992_p8 = scmp.ne.s32.totalorder %s4697_s4, %s3991_s19  ;;  %s39_s16 = int_to_ptr.vmem [resolvable:$true] %s38_s16 }
  0x14   :  { %p3995_p9 = scmp.lt.u32.totalorder %s3991_s19, %s4697_s4 }
  0x16   :  { %p3997_p10 = pnand %p3995_p9, %p3992_p8 }
  0x18   :  { %4000 = shalt.err (!%p3997_p10)
}
  0x19   :  { %s4001_s24 = scalar_lea.vmem %s39_s16, 1024  ;;  %p4006_p12 = scmp.lt.s32.totalorder %s39_s16, %s39_s16 }
  0x1a   :  { %p4002_p11 = scmp.ne.s32.totalorder %s39_s16, %s4001_s24  ;;  %p4007_p13 = scmp.lt.s32.totalorder %s4001_s24, %s4001_s24 }
  0x1c   :  { %p4008_p0 = por %p4007_p13, %p4006_p12 }
  0x1e   :  { %p4009_p1 = pnand %p4008_p0, %p4002_p11 }
  0x20   :  { %4012 = shalt.err (!%p4009_p1)
}
  0x21   :  { %44 = dma.hbm_to_vmem [thread:$0]  %s4697_s4, 1024, %s39_s16, [#allocation5], %s4018_s11, %s4018_s11, %s4019_s12  }
  0x22   :  { %4013 = dma.done.wait [#allocation3], 1024  }
  0x23   :  { %4014 = vsyncadd [#allocation3], 4294966272 }
  0x24   :  { %4015 = dma.done.wait [#allocation5], 1024  }
  0x25   :  { %4016 = vsyncadd [#allocation5], 4294966272  ;;  %v4021_v0 = vmov 0   ;;  %v4022_v1 = vmov 0.0   ;;  %v4093_v2 = vld [vmem:[%s4695_s2 + $0x4] ss:$8 sps:$4 sm:$0xff]  }
  0x26   :  { %199 = vmatprep.mubr.bf16.mxu0 %v4021_v0  ;;  %3420 = vmatprep.subr.bf16.mxu1 %v4022_v1  ;;  %v4098_v3 = vld [vmem:[%s4695_s2] ss:$8 sps:$4 sm:$0xff]   ;;  %v4104_v4 = vld [vmem:[%s4695_s2 + $0x14] ss:$8 sps:$4 sm:$0xff]   ;;  %v4110_v5 = vld [vmem:[%s4695_s2 + $0x10] ss:$8 sps:$4 sm:$0xff]  }
  0x27   :  { %167 = vmatprep.subr.bf16.mxu0 %v4093_v2  ;;  %v4116_v6 = vld [vmem:[%s4695_s2 + $0x24] ss:$8 sps:$4 sm:$0xff]   ;;  %v4122_v7 = vld [vmem:[%s4695_s2 + $0x20] ss:$8 sps:$4 sm:$0xff]   ;;  %v4128_v8 = vld [vmem:[%s4695_s2 + $0x34] ss:$8 sps:$4 sm:$0xff]  }
  0x28   :  { %168 = vmatpush1.bf16.msra.mxu0 %v4098_v3  ;;  %v4133_v9 = vld [vmem:[%s4695_s2 + $0x30] ss:$8 sps:$4 sm:$0xff]   ;;  %v3771_v10 = vld [vmem:[#allocation4] sm:$0xff]   ;;  %v3773_v12 = vld [vmem:[#allocation4 + $0x8] sm:$0xff]   ;;  %vm4023_vm0 = vmmov 0  }
  0x29   :  { %169 = vmatprep.subr.bf16.mxu0 %v4104_v4  ;;  %v4140_v11 = vld [vmem:[%s4695_s2 + $0x44] ss:$8 sps:$4 sm:$0xff]   ;;  %3421 = vmatpush3.bf16.msra.mxu1 %v3771_v10  ;;  %v4147_v13 = vld [vmem:[%s4695_s2 + $0x40] ss:$8 sps:$4 sm:$0xff]   ;;  %v4153_v14 = vld [vmem:[%s4695_s2 + $0x54] ss:$8 sps:$4 sm:$0xff]  }
  0x2a   :  { %3422 = vmatprep.subr.bf16.mxu1 %v4022_v1  ;;  %v3775_v15 = vld [vmem:[#allocation4 + $0x10] sm:$0xff]   ;;  %v4166_v17 = vld [vmem:[%s4695_s2 + $0x64] ss:$8 sps:$4 sm:$0xff]   ;;  %v3777_v18 = vld [vmem:[#allocation4 + $0x18] sm:$0xff]   ;;  %3436 = vmatprep.mubr.msk.bf16.mxu1 %vm4023_vm0, %v4022_v1 }
  0x2b   :  { %v4160_v16 = vld [vmem:[%s4695_s2 + $0x50] ss:$8 sps:$4 sm:$0xff]   ;;  %v4173_v19 = vld [vmem:[%s4695_s2 + $0x60] ss:$8 sps:$4 sm:$0xff]   ;;  %v4179_v20 = vld [vmem:[%s4695_s2 + $0x74] ss:$8 sps:$4 sm:$0xff]  }
  0x2c   :  { %170 = vmatpush1.bf16.msra.mxu0 %v4110_v5  ;;  %v4184_v21 = vld [vmem:[%s4695_s2 + $0x70] ss:$8 sps:$4 sm:$0xff]   ;;  %v58_v22 = vld [vmem:[%s4693_s0] sm:$0xff]  ;;  %v3781_v24 = vld [vmem:[#allocation4 + $0x28] sm:$0xff]  }
  0x2d   :  { %171 = vmatprep.subr.bf16.mxu0 %v4116_v6  ;;  %3423 = vmatpush3.bf16.msra.mxu1 %v3773_v12  ;;  %v3779_v23 = vld [vmem:[#allocation4 + $0x20] sm:$0xff]   ;;  %v70_v26 = vpack.c.bf16 %v58_v22, %v58_v22  ;;  %v3783_v27 = vld [vmem:[#allocation4 + $0x30] sm:$0xff]   ;;  %v3774_v28 = vld [vmem:[#allocation2 + $0x8] sm:$0xff]  }
  0x2e   :  { %3424 = vmatprep.subr.bf16.mxu1 %v4022_v1  ;;  %v3772_v25 = vld [vmem:[#allocation2] sm:$0xff]   ;;  %v3776_v29 = vld [vmem:[#allocation2 + $0x10] sm:$0xff]   ;;  %v3778_v30 = vld [vmem:[#allocation2 + $0x18] sm:$0xff]  }
  0x2f   :  { %v3780_v31 = vld [vmem:[#allocation2 + $0x20] sm:$0xff]   ;;  %v3782_v32 = vld [vmem:[#allocation2 + $0x28] sm:$0xff]   ;;  %v3784_v33 = vld [vmem:[#allocation2 + $0x30] sm:$0xff]  }
  0x30   :  { %172 = vmatpush1.bf16.msra.mxu0 %v4122_v7  ;;  %v3785_v34 = vld [vmem:[#allocation4 + $0x38] sm:$0xff]   ;;  %v68_v36 = vld [vmem:[%s4694_s1] sm:$0xff]  ;;  %v69_v37 = vld [vmem:[%s4694_s1 + $0x8] sm:$0xff] }
  0x31   :  { %173 = vmatprep.subr.bf16.mxu0 %v4128_v8  ;;  %3425 = vmatpush3.bf16.msra.mxu1 %v3775_v15  ;;  %v3786_v35 = vld [vmem:[#allocation2 + $0x38] sm:$0xff]   ;;  %v3787_v46 = vld [vmem:[#allocation4] sm:$0xff]   ;;  %v3789_v48 = vld [vmem:[#allocation4 + $0x8] sm:$0xff]  }
  0x32   :  { %3426 = vmatprep.subr.bf16.mxu1 %v4022_v1  ;;  %v3788_v47 = vld [vmem:[#allocation2] sm:$0xff]   ;;  %v3790_v49 = vld [vmem:[#allocation2 + $0x8] sm:$0xff]   ;;  %v3791_v50 = vld [vmem:[#allocation4 + $0x10] sm:$0xff]  }
  0x33   :  { %v3792_v51 = vld [vmem:[#allocation2 + $0x10] sm:$0xff]   ;;  %v3793_v52 = vld [vmem:[#allocation4 + $0x18] sm:$0xff]   ;;  %v3795_v54 = vld [vmem:[#allocation4 + $0x20] sm:$0xff]  }
  0x34   :  { %174 = vmatpush1.bf16.msra.mxu0 %v4133_v9  ;;  %v3794_v53 = vld [vmem:[#allocation2 + $0x18] sm:$0xff]   ;;  %v3796_v55 = vld [vmem:[#allocation2 + $0x20] sm:$0xff]   ;;  %v3797_v56 = vld [vmem:[#allocation4 + $0x28] sm:$0xff]  }
  0x35   :  { %175 = vmatprep.subr.bf16.mxu0 %v4140_v11  ;;  %3427 = vmatpush3.bf16.msra.mxu1 %v3777_v18  ;;  %v3798_v57 = vld [vmem:[#allocation2 + $0x28] sm:$0xff]   ;;  %v3799_v58 = vld [vmem:[#allocation4 + $0x30] sm:$0xff]   ;;  %v3801_v60 = vld [vmem:[#allocation4 + $0x38] sm:$0xff]  }
  0x36   :  { %3428 = vmatprep.subr.bf16.mxu1 %v4022_v1  ;;  %v3800_v59 = vld [vmem:[#allocation2 + $0x30] sm:$0xff]   ;;  %v3802_v61 = vld [vmem:[#allocation2 + $0x38] sm:$0xff]   ;;  %v4256_v12 = vld [vmem:[%s4698_s5] ss:$0 sm:$0xff] }
  0x38   :  { %176 = vmatpush1.bf16.msra.mxu0 %v4147_v13 }
  0x39   :  { %177 = vmatprep.subr.bf16.mxu0 %v4153_v14  ;;  %3429 = vmatpush3.bf16.msra.mxu1 %v3779_v23 }
  0x3a   :  { %3430 = vmatprep.subr.bf16.mxu1 %v4022_v1 }
  0x3c   :  { %178 = vmatpush1.bf16.msra.mxu0 %v4160_v16 }
  0x3d   :  { %179 = vmatprep.subr.bf16.mxu0 %v4166_v17  ;;  %3431 = vmatpush3.bf16.msra.mxu1 %v3781_v24 }
  0x3e   :  { %3432 = vmatprep.subr.bf16.mxu1 %v4022_v1 }
  0x40   :  { %180 = vmatpush1.bf16.msra.mxu0 %v4173_v19 }
  0x41   :  { %181 = vmatprep.subr.bf16.mxu0 %v4179_v20  ;;  %3433 = vmatpush3.bf16.msra.mxu1 %v3783_v27  ;;  %v3032_v27 = vld [vmem:[%s4694_s1 + $0x18] sm:$0xff] }
  0x42   :  { %3434 = vmatprep.subr.bf16.mxu1 %v4022_v1 }
  0x44   :  { %182 = vmatpush1.bf16.msra.mxu0 %v4184_v21 }
  0x45   :  { %3440 = vmatprep.subr.bf16.mxu0 %v4022_v1  ;;  %3435 = vmatpush3.bf16.msra.mxu1 %v3785_v34 }
  0x46   :  { %531 = vmatprep.subr.bf16.mxu1 %v4093_v2 }
  0x47   :  { %200 = vmatmul.mubr.bf16.vlgmr.msra.gmra.mrb[0].mxu0 %v70_v26 }
  0x48   :  { %3441 = vmatpush3.bf16.msra.mxu0 %v3772_v25  ;;  %3456 = vmatprep.mubr.msk.bf16.mxu0 %vm4023_vm0, %v4022_v1 }
  0x49   :  { %3442 = vmatprep.subr.bf16.mxu0 %v4022_v1 }
  0x4c   :  { %3443 = vmatpush3.bf16.msra.mxu0 %v3774_v28 }
  0x4d   :  { %3444 = vmatprep.subr.bf16.mxu0 %v4022_v1 }
  0x50   :  { %3445 = vmatpush3.bf16.msra.mxu0 %v3776_v29 }
  0x51   :  { %3446 = vmatprep.subr.bf16.mxu0 %v4022_v1 }
  0x54   :  { %3447 = vmatpush3.bf16.msra.mxu0 %v3778_v30 }
  0x55   :  { %3448 = vmatprep.subr.bf16.mxu0 %v4022_v1 }
  0x58   :  { %3449 = vmatpush3.bf16.msra.mxu0 %v3780_v31 }
  0x59   :  { %3450 = vmatprep.subr.bf16.mxu0 %v4022_v1 }
  0x5c   :  { %3451 = vmatpush3.bf16.msra.mxu0 %v3782_v32 }
  0x5d   :  { %3452 = vmatprep.subr.bf16.mxu0 %v4022_v1 }
  0x60   :  { %3453 = vmatpush3.bf16.msra.mxu0 %v3784_v33 }
  0x61   :  { %3454 = vmatprep.subr.bf16.mxu0 %v4022_v1 }
  0x64   :  { %3455 = vmatpush3.bf16.msra.mxu0 %v3786_v35 }
  0x65   :  { %3460 = vmatprep.subr.bf16.mxu0 %v4022_v1 }
 0x11a   :  { %v201_v38 = vpop.f32.mrb[0].mxu0 }
 0x11b   :  { %v208_v39 = vadd.f32 %v201_v38, %v68_v36  ;;  %v203_v40 = vpop.f32.mrb[1].mxu0  ;;  %v3815_v36 = vld [vmem:[#allocation4 + $0x30] sm:$0xff]   ;;  %v3817_v38 = vld [vmem:[#allocation4 + $0x38] sm:$0xff]  }
 0x11c   :  { %v209_v41 = vadd.f32 %v203_v40, %v69_v37  ;;  %v205_v42 = vpop.f32.mrb[2].mxu0  ;;  %v3816_v37 = vld [vmem:[#allocation2 + $0x30] sm:$0xff]   ;;  %v3955_v40 = vld [vmem:[%s4695_s2 + $0x4] ss:$8 sps:$4 sm:$0xff]  }
 0x11d   :  { %v210_v43 = vpack.c.bf16 %v208_v39, %v208_v39  ;;  %v206_v44 = vpop.f32.mrb[3].mxu0  ;;  %v3818_v39 = vld [vmem:[#allocation2 + $0x38] sm:$0xff]  }
 0x11e   :  { %v227_v45 = vpack.c.bf16 %v209_v41, %v209_v41 }
 0x11f   :  { %3457 = vmatmul.mubr.bf16.vlgmr.msra.gmra.mrb[4].mxu0 %v210_v43 }
 0x120   :  { %3437 = vmatmul.mubr.bf16.vlgmr.msra.gmra.mrb[0].mxu1 %v227_v45  ;;  %3476 = vmatprep.mubr.msk.bf16.mxu0 %vm4023_vm0, %v4022_v1 }
 0x121   :  { %532 = vmatpush1.bf16.msra.mxu1 %v4098_v3  ;;  %563 = vmatprep.mubr.bf16.mxu1 %v4021_v0 }
 0x122   :  { %533 = vmatprep.subr.bf16.mxu1 %v4104_v4  ;;  %3461 = vmatpush3.bf16.msra.mxu0 %v3787_v46 }
 0x123   :  { %3462 = vmatprep.subr.bf16.mxu0 %v4022_v1 }
 0x125   :  { %534 = vmatpush1.bf16.msra.mxu1 %v4110_v5 }
 0x126   :  { %535 = vmatprep.subr.bf16.mxu1 %v4116_v6  ;;  %3463 = vmatpush3.bf16.msra.mxu0 %v3789_v48 }
 0x127   :  { %3464 = vmatprep.subr.bf16.mxu0 %v4022_v1 }
 0x129   :  { %536 = vmatpush1.bf16.msra.mxu1 %v4122_v7 }
 0x12a   :  { %537 = vmatprep.subr.bf16.mxu1 %v4128_v8  ;;  %3465 = vmatpush3.bf16.msra.mxu0 %v3791_v50 }
 0x12b   :  { %3466 = vmatprep.subr.bf16.mxu0 %v4022_v1 }
 0x12d   :  { %538 = vmatpush1.bf16.msra.mxu1 %v4133_v9 }
 0x12e   :  { %539 = vmatprep.subr.bf16.mxu1 %v4140_v11  ;;  %3467 = vmatpush3.bf16.msra.mxu0 %v3793_v52  ;;  %v3067_v52 = vld [vmem:[%s4694_s1 + $0x28] sm:$0xff] }
 0x12f   :  { %3468 = vmatprep.subr.bf16.mxu0 %v4022_v1 }
 0x131   :  { %540 = vmatpush1.bf16.msra.mxu1 %v4147_v13 }
 0x132   :  { %541 = vmatprep.subr.bf16.mxu1 %v4153_v14  ;;  %3469 = vmatpush3.bf16.msra.mxu0 %v3795_v54 }
 0x133   :  { %3470 = vmatprep.subr.bf16.mxu0 %v4022_v1 }
 0x135   :  { %542 = vmatpush1.bf16.msra.mxu1 %v4160_v16 }
 0x136   :  { %543 = vmatprep.subr.bf16.mxu1 %v4166_v17  ;;  %3471 = vmatpush3.bf16.msra.mxu0 %v3797_v56 }
 0x137   :  { %3472 = vmatprep.subr.bf16.mxu0 %v4022_v1 }
 0x139   :  { %544 = vmatpush1.bf16.msra.mxu1 %v4173_v19 }
 0x13a   :  { %545 = vmatprep.subr.bf16.mxu1 %v4179_v20  ;;  %3473 = vmatpush3.bf16.msra.mxu0 %v3799_v58 }
 0x13b   :  { %3474 = vmatprep.subr.bf16.mxu0 %v4022_v1 }
 0x13d   :  { %546 = vmatpush1.bf16.msra.mxu1 %v4184_v21 }
 0x13e   :  { %3480 = vmatprep.subr.bf16.mxu1 %v4022_v1  ;;  %3475 = vmatpush3.bf16.msra.mxu0 %v3801_v60 }
 0x13f   :  { %896 = vmatprep.subr.bf16.mxu0 %v4093_v2  ;;  %v3031_v2 = vld [vmem:[%s4694_s1 + $0x10] sm:$0xff] }
 0x140   :  { %564 = vmatmul.mubr.bf16.vlgmr.msra.gmra.mrb[4].mxu1 %v210_v43 }
 0x141   :  { %3496 = vmatprep.mubr.msk.bf16.mxu1 %vm4023_vm0, %v4022_v1  ;;  %3481 = vmatpush3.bf16.msra.mxu1 %v3788_v47 }
 0x142   :  { %3482 = vmatprep.subr.bf16.mxu1 %v4022_v1 }
 0x145   :  { %3483 = vmatpush3.bf16.msra.mxu1 %v3790_v49 }
 0x146   :  { %3484 = vmatprep.subr.bf16.mxu1 %v4022_v1 }
 0x149   :  { %3485 = vmatpush3.bf16.msra.mxu1 %v3792_v51  ;;  %v3066_v51 = vld [vmem:[%s4694_s1 + $0x20] sm:$0xff] }
 0x14a   :  { %3486 = vmatprep.subr.bf16.mxu1 %v4022_v1 }
 0x14d   :  { %3487 = vmatpush3.bf16.msra.mxu1 %v3794_v53 }
 0x14e   :  { %3488 = vmatprep.subr.bf16.mxu1 %v4022_v1 }
 0x151   :  { %3489 = vmatpush3.bf16.msra.mxu1 %v3796_v55 }
 0x152   :  { %3490 = vmatprep.subr.bf16.mxu1 %v4022_v1 }
 0x155   :  { %3491 = vmatpush3.bf16.msra.mxu1 %v3798_v57 }
 0x156   :  { %3492 = vmatprep.subr.bf16.mxu1 %v4022_v1 }
 0x159   :  { %3493 = vmatpush3.bf16.msra.mxu1 %v3800_v59 }
 0x15a   :  { %3494 = vmatprep.subr.bf16.mxu1 %v4022_v1 }
 0x15d   :  { %3495 = vmatpush3.bf16.msra.mxu1 %v3802_v61  ;;  %v3956_v61 = vld [vmem:[%s4695_s2] ss:$8 sps:$4 sm:$0xff]  }
 0x15e   :  { %3500 = vmatprep.subr.bf16.mxu1 %v4022_v1 }
 0x1f2   :  { %v414_v62 = vpop.f32.mrb[4].mxu0 }
 0x1f3   :  { %v326_v63 = vpop.f32.mrb[0].mxu1  ;;  %v3458_v10 = vpop.f32.mrb[5].mxu0 }
 0x1f4   :  { %v415_v15 = vadd.f32 %v414_v62, %v326_v63  ;;  %v3438_v18 = vpop.f32.mrb[1].mxu1  ;;  %v417_v22 = vpop.f32.mrb[6].mxu0  ;;  %v3957_v62 = vld [vmem:[%s4695_s2 + $0x14] ss:$8 sps:$4 sm:$0xff]   ;;  %v3958_v63 = vld [vmem:[%s4695_s2 + $0x10] ss:$8 sps:$4 sm:$0xff]  }
 0x1f5   :  { %v329_v23 = vpop.f32.mrb[2].mxu1  ;;  %v3459_v24 = vpop.f32.mrb[7].mxu0  ;;  %v3959_v10 = vld [vmem:[%s4695_s2 + $0x24] ss:$8 sps:$4 sm:$0xff]   ;;  %v3961_v18 = vld [vmem:[%s4695_s2 + $0x34] ss:$8 sps:$4 sm:$0xff]  }
 0x1f6   :  { %v3439_v25 = vpop.f32.mrb[3].mxu1  ;;  %v4259_v26 = vadd.f32 %v4256_v12, %v415_v15  ;;  %v3960_v15 = vld [vmem:[%s4695_s2 + $0x20] ss:$8 sps:$4 sm:$0xff]   ;;  %v3962_v22 = vld [vmem:[%s4695_s2 + $0x30] ss:$8 sps:$4 sm:$0xff]  }
 0x1f7   :  { %v3963_v23 = vld [vmem:[%s4695_s2 + $0x44] ss:$8 sps:$4 sm:$0xff]   ;;  %v3964_v24 = vld [vmem:[%s4695_s2 + $0x40] ss:$8 sps:$4 sm:$0xff]   ;;  %v3965_v25 = vld [vmem:[%s4695_s2 + $0x54] ss:$8 sps:$4 sm:$0xff]  }
 0x1f8   :  { %421 = vmax.xlane.f32.xlu0 %v4259_v26 }
 0x213   :  { %v565_v28 = vpop.f32.mrb[4].mxu1 }
 0x214   :  { %v572_v29 = vadd.f32 %v3031_v2, %v565_v28  ;;  %v567_v30 = vpop.f32.mrb[5].mxu1  ;;  %v3966_v2 = vld [vmem:[%s4695_s2 + $0x50] ss:$8 sps:$4 sm:$0xff]   ;;  %v3819_v28 = vld [vmem:[#allocation4] sm:$0xff]  }
 0x215   :  { %v573_v31 = vadd.f32 %v3032_v27, %v567_v30  ;;  %v569_v32 = vpop.f32.mrb[6].mxu1  ;;  %v3967_v27 = vld [vmem:[%s4695_s2 + $0x64] ss:$8 sps:$4 sm:$0xff]  }
 0x216   :  { %v574_v33 = vpack.c.bf16 %v572_v29, %v572_v29  ;;  %v570_v34 = vpop.f32.mrb[7].mxu1  ;;  %v3820_v29 = vld [vmem:[#allocation2] sm:$0xff]   ;;  %v3821_v30 = vld [vmem:[#allocation4 + $0x8] sm:$0xff]   ;;  %v3826_v32 = vld [vmem:[#allocation2 + $0x18] sm:$0xff]  }
 0x217   :  { %v591_v35 = vpack.c.bf16 %v573_v31, %v573_v31  ;;  %v3822_v31 = vld [vmem:[#allocation2 + $0x8] sm:$0xff]   ;;  %v3828_v34 = vld [vmem:[#allocation2 + $0x20] sm:$0xff]  }
 0x218   :  { %3497 = vmatmul.mubr.bf16.vlgmr.msra.gmra.mrb[8].mxu1 %v574_v33 }
 0x219   :  { %3477 = vmatmul.mubr.bf16.vlgmr.msra.gmra.mrb[8].mxu0 %v591_v35  ;;  %3516 = vmatprep.mubr.msk.bf16.mxu1 %vm4023_vm0, %v4022_v1  ;;  %v3829_v35 = vld [vmem:[#allocation4 + $0x28] sm:$0xff]  }
 0x21a   :  { %897 = vmatpush1.bf16.msra.mxu0 %v4098_v3  ;;  %928 = vmatprep.mubr.bf16.mxu0 %v4021_v0  ;;  %v3803_v3 = vld [vmem:[#allocation4] sm:$0xff]  }
 0x21b   :  { %898 = vmatprep.subr.bf16.mxu0 %v4104_v4  ;;  %v3804_v4 = vld [vmem:[#allocation2] sm:$0xff]   ;;  %3501 = vmatpush3.bf16.msra.mxu1 %v3803_v3  ;;  %v3830_v3 = vld [vmem:[#allocation2 + $0x28] sm:$0xff]  }
 0x21c   :  { %3502 = vmatprep.subr.bf16.mxu1 %v4022_v1 }
 0x21e   :  { %899 = vmatpush1.bf16.msra.mxu0 %v4110_v5  ;;  %v3805_v5 = vld [vmem:[#allocation4 + $0x8] sm:$0xff]  }
 0x21f   :  { %900 = vmatprep.subr.bf16.mxu0 %v4116_v6  ;;  %v3806_v6 = vld [vmem:[#allocation2 + $0x8] sm:$0xff]   ;;  %3503 = vmatpush3.bf16.msra.mxu1 %v3805_v5  ;;  %v3832_v5 = vld [vmem:[#allocation2 + $0x30] sm:$0xff]  }
 0x220   :  { %3504 = vmatprep.subr.bf16.mxu1 %v4022_v1 }
 0x222   :  { %901 = vmatpush1.bf16.msra.mxu0 %v4122_v7  ;;  %v3807_v7 = vld [vmem:[#allocation4 + $0x10] sm:$0xff]  }
 0x223   :  { %902 = vmatprep.subr.bf16.mxu0 %v4128_v8  ;;  %v3808_v8 = vld [vmem:[#allocation2 + $0x10] sm:$0xff]   ;;  %3505 = vmatpush3.bf16.msra.mxu1 %v3807_v7  ;;  %v3834_v7 = vld [vmem:[#allocation2 + $0x38] sm:$0xff]  }
 0x224   :  { %3506 = vmatprep.subr.bf16.mxu1 %v4022_v1 }
 0x226   :  { %903 = vmatpush1.bf16.msra.mxu0 %v4133_v9  ;;  %v3809_v9 = vld [vmem:[#allocation4 + $0x18] sm:$0xff]  }
 0x227   :  { %904 = vmatprep.subr.bf16.mxu0 %v4140_v11  ;;  %v3810_v11 = vld [vmem:[#allocation2 + $0x18] sm:$0xff]   ;;  %3507 = vmatpush3.bf16.msra.mxu1 %v3809_v9 }
 0x228   :  { %3508 = vmatprep.subr.bf16.mxu1 %v4022_v1 }
 0x22a   :  { %905 = vmatpush1.bf16.msra.mxu0 %v4147_v13  ;;  %v3811_v13 = vld [vmem:[#allocation4 + $0x20] sm:$0xff]  }
 0x22b   :  { %906 = vmatprep.subr.bf16.mxu0 %v4153_v14  ;;  %v3812_v14 = vld [vmem:[#allocation2 + $0x20] sm:$0xff]   ;;  %3509 = vmatpush3.bf16.msra.mxu1 %v3811_v13 }
 0x22c   :  { %3510 = vmatprep.subr.bf16.mxu1 %v4022_v1 }
 0x22e   :  { %907 = vmatpush1.bf16.msra.mxu0 %v4160_v16  ;;  %v3813_v16 = vld [vmem:[#allocation4 + $0x28] sm:$0xff]  }
 0x22f   :  { %908 = vmatprep.subr.bf16.mxu0 %v4166_v17  ;;  %v3814_v17 = vld [vmem:[#allocation2 + $0x28] sm:$0xff]   ;;  %3511 = vmatpush3.bf16.msra.mxu1 %v3813_v16 }
 0x230   :  { %3512 = vmatprep.subr.bf16.mxu1 %v4022_v1 }
 0x232   :  { %909 = vmatpush1.bf16.msra.mxu0 %v4173_v19 }
 0x233   :  { %910 = vmatprep.subr.bf16.mxu0 %v4179_v20  ;;  %3513 = vmatpush3.bf16.msra.mxu1 %v3815_v36 }
 0x234   :  { %3514 = vmatprep.subr.bf16.mxu1 %v4022_v1 }
 0x236   :  { %911 = vmatpush1.bf16.msra.mxu0 %v4184_v21 }
 0x237   :  { %3520 = vmatprep.subr.bf16.mxu0 %v4022_v1  ;;  %3515 = vmatpush3.bf16.msra.mxu1 %v3817_v38 }
 0x238   :  { %1261 = vmatprep.subr.bf16.mxu1 %v3955_v40  ;;  %v3101_v40 = vld [vmem:[%s4694_s1 + $0x30] sm:$0xff] }
 0x239   :  { %929 = vmatmul.mubr.bf16.vlgmr.msra.gmra.mrb[12].mxu0 %v574_v33  ;;  %v3827_v33 = vld [vmem:[#allocation4 + $0x20] sm:$0xff]  }
 0x23a   :  { %3536 = vmatprep.mubr.msk.bf16.mxu0 %vm4023_vm0, %v4022_v1  ;;  %3521 = vmatpush3.bf16.msra.mxu0 %v3804_v4  ;;  %v3831_v4 = vld [vmem:[#allocation4 + $0x30] sm:$0xff]  }
 0x23b   :  { %3522 = vmatprep.subr.bf16.mxu0 %v4022_v1 }
 0x23e   :  { %3523 = vmatpush3.bf16.msra.mxu0 %v3806_v6  ;;  %v3833_v6 = vld [vmem:[#allocation4 + $0x38] sm:$0xff]  }
 0x23f   :  { %3524 = vmatprep.subr.bf16.mxu0 %v4022_v1 }
 0x242   :  { %3525 = vmatpush3.bf16.msra.mxu0 %v3808_v8  ;;  %v4379_v8 = vld [vmem:[%s4695_s2 + $0x4] ss:$8 sps:$4 sm:$0xff]  }
 0x243   :  { %3526 = vmatprep.subr.bf16.mxu0 %v4022_v1 }
 0x246   :  { %3527 = vmatpush3.bf16.msra.mxu0 %v3810_v11 }
 0x247   :  { %3528 = vmatprep.subr.bf16.mxu0 %v4022_v1 }
 0x24a   :  { %3529 = vmatpush3.bf16.msra.mxu0 %v3812_v14 }
 0x24b   :  { %3530 = vmatprep.subr.bf16.mxu0 %v4022_v1 }
 0x24e   :  { %3531 = vmatpush3.bf16.msra.mxu0 %v3814_v17 }
 0x24f   :  { %3532 = vmatprep.subr.bf16.mxu0 %v4022_v1 }
 0x252   :  { %3533 = vmatpush3.bf16.msra.mxu0 %v3816_v37 }
 0x253   :  { %3534 = vmatprep.subr.bf16.mxu0 %v4022_v1 }
 0x256   :  { %3535 = vmatpush3.bf16.msra.mxu0 %v3818_v39 }
 0x257   :  { %3540 = vmatprep.subr.bf16.mxu0 %v4022_v1 }
 0x2eb   :  { %v778_v41 = vpop.f32.mrb[8].mxu1 }
 0x2ec   :  { %v690_v42 = vpop.f32.mrb[8].mxu0  ;;  %v3498_v43 = vpop.f32.mrb[9].mxu1 }
 0x2ed   :  { %v779_v44 = vadd.f32 %v778_v41, %v690_v42  ;;  %v3478_v45 = vpop.f32.mrb[9].mxu0  ;;  %v781_v46 = vpop.f32.mrb[10].mxu1  ;;  %v3102_v41 = vld [vmem:[%s4694_s1 + $0x38] sm:$0xff] }
 0x2ee   :  { %v693_v47 = vpop.f32.mrb[10].mxu0  ;;  %v3499_v48 = vpop.f32.mrb[11].mxu1 }
 0x2ef   :  { %v3479_v49 = vpop.f32.mrb[11].mxu0  ;;  %v4308_v50 = vadd.f32 %v4256_v12, %v779_v44 }
 0x2f0   :  { %v4396_v49 = vld [vmem:[%s4695_s2] ss:$8 sps:$4 sm:$0xff]  }
 0x2f1   :  { %785 = vmax.xlane.f32.xlu0 %v4308_v50 }
 0x30c   :  { %v930_v53 = vpop.f32.mrb[12].mxu0 }
 0x30d   :  { %v937_v54 = vadd.f32 %v3066_v51, %v930_v53  ;;  %v932_v55 = vpop.f32.mrb[13].mxu0  ;;  %v4409_v53 = vld [vmem:[%s4695_s2 + $0x10] ss:$8 sps:$4 sm:$0xff]  }
 0x30e   :  { %v938_v56 = vadd.f32 %v3067_v52, %v932_v55  ;;  %v934_v57 = vpop.f32.mrb[14].mxu0  ;;  %v4401_v52 = vld [vmem:[%s4695_s2 + $0x14] ss:$8 sps:$4 sm:$0xff]   ;;  %v4422_v55 = vld [vmem:[%s4695_s2 + $0x20] ss:$8 sps:$4 sm:$0xff]  }
 0x30f   :  { %v939_v58 = vpack.c.bf16 %v937_v54, %v937_v54  ;;  %v935_v59 = vpop.f32.mrb[15].mxu0  ;;  %v4416_v54 = vld [vmem:[%s4695_s2 + $0x24] ss:$8 sps:$4 sm:$0xff]   ;;  %v4434_v57 = vld [vmem:[%s4695_s2 + $0x30] ss:$8 sps:$4 sm:$0xff]  }
 0x310   :  { %v956_v60 = vpack.c.bf16 %v938_v56, %v938_v56  ;;  %v4428_v56 = vld [vmem:[%s4695_s2 + $0x34] ss:$8 sps:$4 sm:$0xff]   ;;  %v4446_v59 = vld [vmem:[%s4695_s2 + $0x40] ss:$8 sps:$4 sm:$0xff]  }
 0x311   :  { %3537 = vmatmul.mubr.bf16.vlgmr.msra.gmra.mrb[16].mxu0 %v939_v58 }
 0x312   :  { %3517 = vmatmul.mubr.bf16.vlgmr.msra.gmra.mrb[12].mxu1 %v956_v60  ;;  %3556 = vmatprep.mubr.msk.bf16.mxu0 %vm4023_vm0, %v4022_v1  ;;  %v4452_v60 = vld [vmem:[%s4695_s2 + $0x54] ss:$8 sps:$4 sm:$0xff]  }
 0x313   :  { %1262 = vmatpush1.bf16.msra.mxu1 %v3956_v61  ;;  %1293 = vmatprep.mubr.bf16.mxu1 %v4021_v0  ;;  %v4458_v61 = vld [vmem:[%s4695_s2 + $0x50] ss:$8 sps:$4 sm:$0xff]  }
 0x314   :  { %1263 = vmatprep.subr.bf16.mxu1 %v3957_v62  ;;  %3541 = vmatpush3.bf16.msra.mxu0 %v3819_v28  ;;  %v4464_v62 = vld [vmem:[%s4695_s2 + $0x64] ss:$8 sps:$4 sm:$0xff]   ;;  %v3866_v28 = vld [vmem:[#allocation2 + $0x18] sm:$0xff]  }
 0x315   :  { %3542 = vmatprep.subr.bf16.mxu0 %v4022_v1 }
 0x317   :  { %1264 = vmatpush1.bf16.msra.mxu1 %v3958_v63  ;;  %v4470_v63 = vld [vmem:[%s4695_s2 + $0x60] ss:$8 sps:$4 sm:$0xff]  }
 0x318   :  { %1265 = vmatprep.subr.bf16.mxu1 %v3959_v10  ;;  %3543 = vmatpush3.bf16.msra.mxu0 %v3821_v30  ;;  %v4476_v10 = vld [vmem:[%s4695_s2 + $0x74] ss:$8 sps:$4 sm:$0xff]   ;;  %v3868_v30 = vld [vmem:[#allocation2 + $0x20] sm:$0xff]  }
 0x319   :  { %3544 = vmatprep.subr.bf16.mxu0 %v4022_v1 }
 0x31b   :  { %1266 = vmatpush1.bf16.msra.mxu1 %v3960_v15  ;;  %v4482_v15 = vld [vmem:[%s4695_s2 + $0x70] ss:$8 sps:$4 sm:$0xff]  }
 0x31c   :  { %1267 = vmatprep.subr.bf16.mxu1 %v3961_v18  ;;  %v3859_v18 = vld [vmem:[#allocation4] sm:$0xff]  }
 0x31f   :  { %1268 = vmatpush1.bf16.msra.mxu1 %v3962_v22  ;;  %v3860_v22 = vld [vmem:[#allocation2] sm:$0xff]  }
 0x320   :  { %1269 = vmatprep.subr.bf16.mxu1 %v3963_v23  ;;  %v3861_v23 = vld [vmem:[#allocation4 + $0x8] sm:$0xff]  }
 0x323   :  { %1270 = vmatpush1.bf16.msra.mxu1 %v3964_v24  ;;  %v3862_v24 = vld [vmem:[#allocation2 + $0x8] sm:$0xff]  }
 0x324   :  { %1271 = vmatprep.subr.bf16.mxu1 %v3965_v25  ;;  %v3863_v25 = vld [vmem:[#allocation4 + $0x10] sm:$0xff]  }
 0x327   :  { %1272 = vmatpush1.bf16.msra.mxu1 %v3966_v2  ;;  %v3864_v2 = vld [vmem:[#allocation2 + $0x10] sm:$0xff]  }
 0x328   :  { %1273 = vmatprep.subr.bf16.mxu1 %v3967_v27  ;;  %v3865_v27 = vld [vmem:[#allocation4 + $0x18] sm:$0xff]  }
 0x32b   :  { %1274 = vmatpush1.bf16.msra.mxu1 %v4173_v19  ;;  %v3823_v19 = vld [vmem:[#allocation4 + $0x10] sm:$0xff]  }
 0x32c   :  { %1275 = vmatprep.subr.bf16.mxu1 %v4179_v20  ;;  %v3824_v20 = vld [vmem:[#allocation2 + $0x10] sm:$0xff]   ;;  %3545 = vmatpush3.bf16.msra.mxu0 %v3823_v19  ;;  %v3870_v19 = vld [vmem:[#allocation2 + $0x28] sm:$0xff]  }
 0x32d   :  { %3546 = vmatprep.subr.bf16.mxu0 %v4022_v1 }
 0x32f   :  { %1276 = vmatpush1.bf16.msra.mxu1 %v4184_v21  ;;  %v3825_v21 = vld [vmem:[#allocation4 + $0x18] sm:$0xff]  }
 0x330   :  { %3560 = vmatprep.subr.bf16.mxu1 %v4022_v1  ;;  %3547 = vmatpush3.bf16.msra.mxu0 %v3825_v21  ;;  %v3872_v21 = vld [vmem:[#allocation2 + $0x30] sm:$0xff]  }
 0x331   :  { %3548 = vmatprep.subr.bf16.mxu0 %v4022_v1 }
 0x332   :  { %1294 = vmatmul.mubr.bf16.vlgmr.msra.gmra.mrb[16].mxu1 %v939_v58  ;;  %v4440_v58 = vld [vmem:[%s4695_s2 + $0x44] ss:$8 sps:$4 sm:$0xff]  }
 0x333   :  { %3576 = vmatprep.mubr.msk.bf16.mxu1 %vm4023_vm0, %v4022_v1  ;;  %3561 = vmatpush3.bf16.msra.mxu1 %v3820_v29  ;;  %v3867_v29 = vld [vmem:[#allocation4 + $0x20] sm:$0xff]  }
 0x334   :  { %3562 = vmatprep.subr.bf16.mxu1 %v4022_v1  ;;  %3549 = vmatpush3.bf16.msra.mxu0 %v3827_v33  ;;  %v3874_v33 = vld [vmem:[#allocation2 + $0x38] sm:$0xff]  }
 0x335   :  { %3550 = vmatprep.subr.bf16.mxu0 %v4022_v1 }
 0x337   :  { %3563 = vmatpush3.bf16.msra.mxu1 %v3822_v31  ;;  %v3869_v31 = vld [vmem:[#allocation4 + $0x28] sm:$0xff]  }
 0x338   :  { %3564 = vmatprep.subr.bf16.mxu1 %v4022_v1  ;;  %3551 = vmatpush3.bf16.msra.mxu0 %v3829_v35 }
 0x339   :  { %3552 = vmatprep.subr.bf16.mxu0 %v4022_v1 }
 0x33b   :  { %3565 = vmatpush3.bf16.msra.mxu1 %v3824_v20  ;;  %v3871_v20 = vld [vmem:[#allocation4 + $0x30] sm:$0xff]  }
 0x33c   :  { %3566 = vmatprep.subr.bf16.mxu1 %v4022_v1  ;;  %3553 = vmatpush3.bf16.msra.mxu0 %v3831_v4 }
 0x33d   :  { %3554 = vmatprep.subr.bf16.mxu0 %v4022_v1 }
 0x33f   :  { %3567 = vmatpush3.bf16.msra.mxu1 %v3826_v32  ;;  %v3873_v32 = vld [vmem:[#allocation4 + $0x38] sm:$0xff]  }
 0x340   :  { %3568 = vmatprep.subr.bf16.mxu1 %v4022_v1  ;;  %3555 = vmatpush3.bf16.msra.mxu0 %v3833_v6 }
 0x341   :  { %1626 = vmatprep.subr.bf16.mxu0 %v4379_v8 }
 0x343   :  { %3569 = vmatpush3.bf16.msra.mxu1 %v3828_v34 }
 0x344   :  { %3570 = vmatprep.subr.bf16.mxu1 %v4022_v1 }
 0x347   :  { %3571 = vmatpush3.bf16.msra.mxu1 %v3830_v3 }
 0x348   :  { %3572 = vmatprep.subr.bf16.mxu1 %v4022_v1 }
 0x34b   :  { %3573 = vmatpush3.bf16.msra.mxu1 %v3832_v5 }
 0x34c   :  { %3574 = vmatprep.subr.bf16.mxu1 %v4022_v1 }
 0x34f   :  { %3575 = vmatpush3.bf16.msra.mxu1 %v3834_v7 }
 0x350   :  { %3580 = vmatprep.subr.bf16.mxu1 %v4022_v1 }
 0x3e4   :  { %v1143_v9 = vpop.f32.mrb[16].mxu0 }
 0x3e5   :  { %v1055_v11 = vpop.f32.mrb[12].mxu1  ;;  %v3538_v13 = vpop.f32.mrb[17].mxu0 }
 0x3e6   :  { %v1144_v14 = vadd.f32 %v1143_v9, %v1055_v11  ;;  %v3518_v16 = vpop.f32.mrb[13].mxu1  ;;  %v1146_v17 = vpop.f32.mrb[18].mxu0 }
 0x3e7   :  { %v1058_v36 = vpop.f32.mrb[14].mxu1  ;;  %v3539_v37 = vpop.f32.mrb[19].mxu0  ;;  %v3137_v16 = vld [vmem:[%s4694_s1 + $0x48] sm:$0xff] }
 0x3e8   :  { %v3519_v38 = vpop.f32.mrb[15].mxu1  ;;  %v4384_v39 = vadd.f32 %v4256_v12, %v1144_v14  ;;  %v3136_v14 = vld [vmem:[%s4694_s1 + $0x40] sm:$0xff] }
 0x3ea   :  { %1150 = vmax.xlane.f32.xlu1 %v4384_v39 }
 0x405   :  { %v1295_v42 = vpop.f32.mrb[16].mxu1 }
 0x406   :  { %v1302_v43 = vadd.f32 %v3101_v40, %v1295_v42  ;;  %v1297_v44 = vpop.f32.mrb[17].mxu1 }
 0x407   :  { %v1303_v45 = vadd.f32 %v3102_v41, %v1297_v44  ;;  %v1299_v46 = vpop.f32.mrb[18].mxu1  ;;  %v3875_v44 = vld [vmem:[#allocation4] sm:$0xff]  }
 0x408   :  { %v1304_v47 = vpack.c.bf16 %v1302_v43, %v1302_v43  ;;  %v1300_v48 = vpop.f32.mrb[19].mxu1  ;;  %v3877_v46 = vld [vmem:[#allocation4 + $0x8] sm:$0xff]  }
 0x409   :  { %v1321_v51 = vpack.c.bf16 %v1303_v45, %v1303_v45  ;;  %v3876_v45 = vld [vmem:[#allocation2] sm:$0xff]   ;;  %v3879_v48 = vld [vmem:[#allocation4 + $0x10] sm:$0xff]  }
 0x40a   :  { %3577 = vmatmul.mubr.bf16.vlgmr.msra.gmra.mrb[20].mxu1 %v1304_v47 }
 0x40b   :  { %3557 = vmatmul.mubr.bf16.vlgmr.msra.gmra.mrb[20].mxu0 %v1321_v51  ;;  %3596 = vmatprep.mubr.msk.bf16.mxu1 %vm4023_vm0, %v4022_v1  ;;  %v3880_v51 = vld [vmem:[#allocation2 + $0x10] sm:$0xff]  }
 0x40c   :  { %1627 = vmatpush1.bf16.msra.mxu0 %v4396_v49  ;;  %1658 = vmatprep.mubr.bf16.mxu0 %v4021_v0 }
 0x40d   :  { %1628 = vmatprep.subr.bf16.mxu0 %v4401_v52  ;;  %3581 = vmatpush3.bf16.msra.mxu1 %v3859_v18  ;;  %v3881_v18 = vld [vmem:[#allocation4 + $0x18] sm:$0xff]  }
 0x40e   :  { %3582 = vmatprep.subr.bf16.mxu1 %v4022_v1 }
 0x410   :  { %1629 = vmatpush1.bf16.msra.mxu0 %v4409_v53 }
 0x411   :  { %1630 = vmatprep.subr.bf16.mxu0 %v4416_v54  ;;  %3583 = vmatpush3.bf16.msra.mxu1 %v3861_v23  ;;  %v3883_v23 = vld [vmem:[#allocation4 + $0x20] sm:$0xff]  }
 0x412   :  { %3584 = vmatprep.subr.bf16.mxu1 %v4022_v1 }
 0x414   :  { %1631 = vmatpush1.bf16.msra.mxu0 %v4422_v55 }
 0x415   :  { %1632 = vmatprep.subr.bf16.mxu0 %v4428_v56  ;;  %3585 = vmatpush3.bf16.msra.mxu1 %v3863_v25  ;;  %v3885_v25 = vld [vmem:[#allocation4 + $0x28] sm:$0xff]  }
 0x416   :  { %3586 = vmatprep.subr.bf16.mxu1 %v4022_v1 }
 0x418   :  { %1633 = vmatpush1.bf16.msra.mxu0 %v4434_v57 }
 0x419   :  { %1634 = vmatprep.subr.bf16.mxu0 %v4440_v58  ;;  %3587 = vmatpush3.bf16.msra.mxu1 %v3865_v27  ;;  %v3887_v27 = vld [vmem:[#allocation4 + $0x30] sm:$0xff]  }
 0x41a   :  { %3588 = vmatprep.subr.bf16.mxu1 %v4022_v1 }
 0x41c   :  { %1635 = vmatpush1.bf16.msra.mxu0 %v4446_v59 }
 0x41d   :  { %1636 = vmatprep.subr.bf16.mxu0 %v4452_v60  ;;  %3589 = vmatpush3.bf16.msra.mxu1 %v3867_v29  ;;  %v3889_v29 = vld [vmem:[#allocation4 + $0x38] sm:$0xff]  }
 0x41e   :  { %3590 = vmatprep.subr.bf16.mxu1 %v4022_v1 }
 0x420   :  { %1637 = vmatpush1.bf16.msra.mxu0 %v4458_v61 }
 0x421   :  { %1638 = vmatprep.subr.bf16.mxu0 %v4464_v62  ;;  %3591 = vmatpush3.bf16.msra.mxu1 %v3869_v31 }
 0x422   :  { %3592 = vmatprep.subr.bf16.mxu1 %v4022_v1 }
 0x424   :  { %1639 = vmatpush1.bf16.msra.mxu0 %v4470_v63 }
 0x425   :  { %1640 = vmatprep.subr.bf16.mxu0 %v4476_v10  ;;  %3593 = vmatpush3.bf16.msra.mxu1 %v3871_v20 }
 0x426   :  { %3594 = vmatprep.subr.bf16.mxu1 %v4022_v1 }
 0x428   :  { %1641 = vmatpush1.bf16.msra.mxu0 %v4482_v15 }
 0x429   :  { %3600 = vmatprep.subr.bf16.mxu0 %v4022_v1  ;;  %3595 = vmatpush3.bf16.msra.mxu1 %v3873_v32 }
 0x42a   :  { %1991 = vmatprep.subr.bf16.mxu1 %v4379_v8 }
 0x42b   :  { %1659 = vmatmul.mubr.bf16.vlgmr.msra.gmra.mrb[24].mxu0 %v1304_v47  ;;  %v3878_v47 = vld [vmem:[#allocation2 + $0x8] sm:$0xff]  }
 0x42c   :  { %3616 = vmatprep.mubr.msk.bf16.mxu0 %vm4023_vm0, %v4022_v1  ;;  %3601 = vmatpush3.bf16.msra.mxu0 %v3860_v22  ;;  %v3882_v22 = vld [vmem:[#allocation2 + $0x18] sm:$0xff]  }
 0x42d   :  { %3602 = vmatprep.subr.bf16.mxu0 %v4022_v1 }
 0x430   :  { %3603 = vmatpush3.bf16.msra.mxu0 %v3862_v24  ;;  %v3884_v24 = vld [vmem:[#allocation2 + $0x20] sm:$0xff]  }
 0x431   :  { %3604 = vmatprep.subr.bf16.mxu0 %v4022_v1 }
 0x434   :  { %3605 = vmatpush3.bf16.msra.mxu0 %v3864_v2  ;;  %v3886_v2 = vld [vmem:[#allocation2 + $0x28] sm:$0xff]  }
 0x435   :  { %3606 = vmatprep.subr.bf16.mxu0 %v4022_v1 }
 0x438   :  { %3607 = vmatpush3.bf16.msra.mxu0 %v3866_v28  ;;  %v3888_v28 = vld [vmem:[#allocation2 + $0x30] sm:$0xff]  }
 0x439   :  { %3608 = vmatprep.subr.bf16.mxu0 %v4022_v1 }
 0x43c   :  { %3609 = vmatpush3.bf16.msra.mxu0 %v3868_v30  ;;  %v3890_v30 = vld [vmem:[#allocation2 + $0x38] sm:$0xff]  }
 0x43d   :  { %3610 = vmatprep.subr.bf16.mxu0 %v4022_v1 }
 0x440   :  { %3611 = vmatpush3.bf16.msra.mxu0 %v3870_v19 }
 0x441   :  { %3612 = vmatprep.subr.bf16.mxu0 %v4022_v1 }
 0x444   :  { %3613 = vmatpush3.bf16.msra.mxu0 %v3872_v21 }
 0x445   :  { %3614 = vmatprep.subr.bf16.mxu0 %v4022_v1 }
 0x448   :  { %3615 = vmatpush3.bf16.msra.mxu0 %v3874_v33 }
 0x449   :  { %3620 = vmatprep.subr.bf16.mxu0 %v4022_v1 }
 0x4dd   :  { %v1508_v34 = vpop.f32.mrb[20].mxu1 }
 0x4de   :  { %v1420_v35 = vpop.f32.mrb[20].mxu0  ;;  %v3578_v3 = vpop.f32.mrb[21].mxu1 }
 0x4df   :  { %v1509_v4 = vadd.f32 %v1508_v34, %v1420_v35  ;;  %v3558_v5 = vpop.f32.mrb[21].mxu0  ;;  %v1511_v6 = vpop.f32.mrb[22].mxu1 }
 0x4e0   :  { %v1423_v7 = vpop.f32.mrb[22].mxu0  ;;  %v3579_v9 = vpop.f32.mrb[23].mxu1  ;;  %v3171_v5 = vld [vmem:[%s4694_s1 + $0x50] sm:$0xff]  ;;  %v3172_v6 = vld [vmem:[%s4694_s1 + $0x58] sm:$0xff] }
 0x4e1   :  { %v3559_v11 = vpop.f32.mrb[23].mxu0  ;;  %v4506_v13 = vadd.f32 %v4256_v12, %v1509_v4 }
 0x4e3   :  { %1515 = vmax.xlane.f32.xlu1 %v4506_v13 }
 0x4fe   :  { %v1660_v17 = vpop.f32.mrb[24].mxu0 }
 0x4ff   :  { %v1667_v36 = vadd.f32 %v3136_v14, %v1660_v17  ;;  %v1662_v37 = vpop.f32.mrb[25].mxu0 }
 0x500   :  { %v1668_v38 = vadd.f32 %v3137_v16, %v1662_v37  ;;  %v1664_v40 = vpop.f32.mrb[26].mxu0 }
 0x501   :  { %v1669_v41 = vpack.c.bf16 %v1667_v36, %v1667_v36  ;;  %v1665_v42 = vpop.f32.mrb[27].mxu0  ;;  %v3892_v40 = vld [vmem:[#allocation2] sm:$0xff]  }
 0x502   :  { %v1686_v43 = vpack.c.bf16 %v1668_v38, %v1668_v38  ;;  %v3891_v38 = vld [vmem:[#allocation4] sm:$0xff]   ;;  %v3894_v42 = vld [vmem:[#allocation2 + $0x8] sm:$0xff]  }
 0x503   :  { %3617 = vmatmul.mubr.bf16.vlgmr.msra.gmra.mrb[28].mxu0 %v1669_v41 }
 0x504   :  { %3597 = vmatmul.mubr.bf16.vlgmr.msra.gmra.mrb[24].mxu1 %v1686_v43  ;;  %3636 = vmatprep.mubr.msk.bf16.mxu0 %vm4023_vm0, %v4022_v1  ;;  %v3895_v43 = vld [vmem:[#allocation4 + $0x10] sm:$0xff]  }
 0x505   :  { %1992 = vmatpush1.bf16.msra.mxu1 %v4396_v49  ;;  %2023 = vmatprep.mubr.bf16.mxu1 %v4021_v0 }
 0x506   :  { %1993 = vmatprep.subr.bf16.mxu1 %v4401_v52  ;;  %3621 = vmatpush3.bf16.msra.mxu0 %v3875_v44  ;;  %v3896_v44 = vld [vmem:[#allocation2 + $0x10] sm:$0xff]  }
 0x507   :  { %3622 = vmatprep.subr.bf16.mxu0 %v4022_v1 }
 0x509   :  { %1994 = vmatpush1.bf16.msra.mxu1 %v4409_v53 }
 0x50a   :  { %1995 = vmatprep.subr.bf16.mxu1 %v4416_v54  ;;  %3623 = vmatpush3.bf16.msra.mxu0 %v3877_v46  ;;  %v3898_v46 = vld [vmem:[#allocation2 + $0x18] sm:$0xff]  }
 0x50b   :  { %3624 = vmatprep.subr.bf16.mxu0 %v4022_v1 }
 0x50d   :  { %1996 = vmatpush1.bf16.msra.mxu1 %v4422_v55 }
 0x50e   :  { %1997 = vmatprep.subr.bf16.mxu1 %v4428_v56  ;;  %3625 = vmatpush3.bf16.msra.mxu0 %v3879_v48  ;;  %v3900_v48 = vld [vmem:[#allocation2 + $0x20] sm:$0xff]  }
 0x50f   :  { %3626 = vmatprep.subr.bf16.mxu0 %v4022_v1 }
 0x511   :  { %1998 = vmatpush1.bf16.msra.mxu1 %v4434_v57 }
 0x512   :  { %1999 = vmatprep.subr.bf16.mxu1 %v4440_v58  ;;  %3627 = vmatpush3.bf16.msra.mxu0 %v3881_v18  ;;  %v3902_v18 = vld [vmem:[#allocation2 + $0x28] sm:$0xff]  }
 0x513   :  { %3628 = vmatprep.subr.bf16.mxu0 %v4022_v1 }
 0x515   :  { %2000 = vmatpush1.bf16.msra.mxu1 %v4446_v59 }
 0x516   :  { %2001 = vmatprep.subr.bf16.mxu1 %v4452_v60  ;;  %3629 = vmatpush3.bf16.msra.mxu0 %v3883_v23  ;;  %v3904_v23 = vld [vmem:[#allocation2 + $0x30] sm:$0xff]  }
 0x517   :  { %3630 = vmatprep.subr.bf16.mxu0 %v4022_v1 }
 0x519   :  { %2002 = vmatpush1.bf16.msra.mxu1 %v4458_v61 }
 0x51a   :  { %2003 = vmatprep.subr.bf16.mxu1 %v4464_v62  ;;  %3631 = vmatpush3.bf16.msra.mxu0 %v3885_v25  ;;  %v3906_v25 = vld [vmem:[#allocation2 + $0x38] sm:$0xff]  }
 0x51b   :  { %3632 = vmatprep.subr.bf16.mxu0 %v4022_v1 }
 0x51d   :  { %2004 = vmatpush1.bf16.msra.mxu1 %v4470_v63 }
 0x51e   :  { %2005 = vmatprep.subr.bf16.mxu1 %v4476_v10  ;;  %3633 = vmatpush3.bf16.msra.mxu0 %v3887_v27 }
 0x51f   :  { %3634 = vmatprep.subr.bf16.mxu0 %v4022_v1 }
 0x521   :  { %2006 = vmatpush1.bf16.msra.mxu1 %v4482_v15 }
 0x522   :  { %3640 = vmatprep.subr.bf16.mxu1 %v4022_v1  ;;  %3635 = vmatpush3.bf16.msra.mxu0 %v3889_v29 }
 0x523   :  { %2356 = vmatprep.subr.bf16.mxu0 %v4379_v8 }
 0x524   :  { %2024 = vmatmul.mubr.bf16.vlgmr.msra.gmra.mrb[28].mxu1 %v1669_v41  ;;  %v3893_v41 = vld [vmem:[#allocation4 + $0x8] sm:$0xff]  }
 0x525   :  { %3656 = vmatprep.mubr.msk.bf16.mxu1 %vm4023_vm0, %v4022_v1  ;;  %3641 = vmatpush3.bf16.msra.mxu1 %v3876_v45  ;;  %v3897_v45 = vld [vmem:[#allocation4 + $0x18] sm:$0xff]  }
 0x526   :  { %3642 = vmatprep.subr.bf16.mxu1 %v4022_v1 }
 0x529   :  { %3643 = vmatpush3.bf16.msra.mxu1 %v3878_v47  ;;  %v3899_v47 = vld [vmem:[#allocation4 + $0x20] sm:$0xff]  }
 0x52a   :  { %3644 = vmatprep.subr.bf16.mxu1 %v4022_v1 }
 0x52d   :  { %3645 = vmatpush3.bf16.msra.mxu1 %v3880_v51  ;;  %v3901_v51 = vld [vmem:[#allocation4 + $0x28] sm:$0xff]  }
 0x52e   :  { %3646 = vmatprep.subr.bf16.mxu1 %v4022_v1 }
 0x531   :  { %3647 = vmatpush3.bf16.msra.mxu1 %v3882_v22  ;;  %v3903_v22 = vld [vmem:[#allocation4 + $0x30] sm:$0xff]  }
 0x532   :  { %3648 = vmatprep.subr.bf16.mxu1 %v4022_v1 }
 0x535   :  { %3649 = vmatpush3.bf16.msra.mxu1 %v3884_v24  ;;  %v3905_v24 = vld [vmem:[#allocation4 + $0x38] sm:$0xff]  }
 0x536   :  { %3650 = vmatprep.subr.bf16.mxu1 %v4022_v1 }
 0x539   :  { %3651 = vmatpush3.bf16.msra.mxu1 %v3886_v2 }
 0x53a   :  { %3652 = vmatprep.subr.bf16.mxu1 %v4022_v1 }
 0x53d   :  { %3653 = vmatpush3.bf16.msra.mxu1 %v3888_v28 }
 0x53e   :  { %3654 = vmatprep.subr.bf16.mxu1 %v4022_v1 }
 0x541   :  { %3655 = vmatpush3.bf16.msra.mxu1 %v3890_v30 }
 0x542   :  { %3660 = vmatprep.subr.bf16.mxu1 %v4022_v1 }
 0x5d6   :  { %v1873_v31 = vpop.f32.mrb[28].mxu0 }
 0x5d7   :  { %v1785_v19 = vpop.f32.mrb[24].mxu1  ;;  %v3618_v20 = vpop.f32.mrb[29].mxu0 }
 0x5d8   :  { %v1874_v21 = vadd.f32 %v1873_v31, %v1785_v19  ;;  %v3598_v32 = vpop.f32.mrb[25].mxu1  ;;  %v1876_v33 = vpop.f32.mrb[30].mxu0 }
 0x5d9   :  { %v1788_v34 = vpop.f32.mrb[26].mxu1  ;;  %v3619_v35 = vpop.f32.mrb[31].mxu0  ;;  %v3207_v33 = vld [vmem:[%s4694_s1 + $0x68] sm:$0xff] }
 0x5da   :  { %v3599_v3 = vpop.f32.mrb[27].mxu1  ;;  %v4553_v4 = vadd.f32 %v4256_v12, %v1874_v21 }
 0x5dc   :  { %1880 = vmax.xlane.f32.xlu0 %v4553_v4 }
 0x5f7   :  { %v2025_v7 = vpop.f32.mrb[28].mxu1 }
 0x5f8   :  { %v2032_v9 = vadd.f32 %v3171_v5, %v2025_v7  ;;  %v2027_v11 = vpop.f32.mrb[29].mxu1 }
 0x5f9   :  { %v2033_v14 = vadd.f32 %v3172_v6, %v2027_v11  ;;  %v2029_v16 = vpop.f32.mrb[30].mxu1 }
 0x5fa   :  { %v2034_v17 = vpack.c.bf16 %v2032_v9, %v2032_v9  ;;  %v2030_v36 = vpop.f32.mrb[31].mxu1 }
 0x5fb   :  { %v2051_v37 = vpack.c.bf16 %v2033_v14, %v2033_v14 }
 0x5fc   :  { %3657 = vmatmul.mubr.bf16.vlgmr.msra.gmra.mrb[32].mxu1 %v2034_v17 }
 0x5fd   :  { %3637 = vmatmul.mubr.bf16.vlgmr.msra.gmra.mrb[32].mxu0 %v2051_v37  ;;  %3676 = vmatprep.mubr.msk.bf16.mxu1 %vm4023_vm0, %v4022_v1 }
 0x5fe   :  { %2357 = vmatpush1.bf16.msra.mxu0 %v4396_v49  ;;  %2388 = vmatprep.mubr.bf16.mxu0 %v4021_v0 }
 0x5ff   :  { %2358 = vmatprep.subr.bf16.mxu0 %v4401_v52  ;;  %3661 = vmatpush3.bf16.msra.mxu1 %v3891_v38 }
 0x600   :  { %3662 = vmatprep.subr.bf16.mxu1 %v4022_v1 }
 0x602   :  { %2359 = vmatpush1.bf16.msra.mxu0 %v4409_v53 }
 0x603   :  { %2360 = vmatprep.subr.bf16.mxu0 %v4416_v54  ;;  %3663 = vmatpush3.bf16.msra.mxu1 %v3893_v41 }
 0x604   :  { %3664 = vmatprep.subr.bf16.mxu1 %v4022_v1 }
 0x606   :  { %2361 = vmatpush1.bf16.msra.mxu0 %v4422_v55 }
 0x607   :  { %2362 = vmatprep.subr.bf16.mxu0 %v4428_v56  ;;  %3665 = vmatpush3.bf16.msra.mxu1 %v3895_v43 }
 0x608   :  { %3666 = vmatprep.subr.bf16.mxu1 %v4022_v1 }
 0x60a   :  { %2363 = vmatpush1.bf16.msra.mxu0 %v4434_v57 }
 0x60b   :  { %2364 = vmatprep.subr.bf16.mxu0 %v4440_v58  ;;  %3667 = vmatpush3.bf16.msra.mxu1 %v3897_v45 }
 0x60c   :  { %3668 = vmatprep.subr.bf16.mxu1 %v4022_v1 }
 0x60e   :  { %2365 = vmatpush1.bf16.msra.mxu0 %v4446_v59 }
 0x60f   :  { %2366 = vmatprep.subr.bf16.mxu0 %v4452_v60  ;;  %3669 = vmatpush3.bf16.msra.mxu1 %v3899_v47 }
 0x610   :  { %3670 = vmatprep.subr.bf16.mxu1 %v4022_v1 }
 0x612   :  { %2367 = vmatpush1.bf16.msra.mxu0 %v4458_v61 }
 0x613   :  { %2368 = vmatprep.subr.bf16.mxu0 %v4464_v62  ;;  %3671 = vmatpush3.bf16.msra.mxu1 %v3901_v51 }
 0x614   :  { %3672 = vmatprep.subr.bf16.mxu1 %v4022_v1 }
 0x616   :  { %2369 = vmatpush1.bf16.msra.mxu0 %v4470_v63 }
 0x617   :  { %2370 = vmatprep.subr.bf16.mxu0 %v4476_v10  ;;  %3673 = vmatpush3.bf16.msra.mxu1 %v3903_v22 }
 0x618   :  { %3674 = vmatprep.subr.bf16.mxu1 %v4022_v1 }
 0x61a   :  { %2371 = vmatpush1.bf16.msra.mxu0 %v4482_v15 }
 0x61b   :  { %3680 = vmatprep.subr.bf16.mxu0 %v4022_v1  ;;  %3675 = vmatpush3.bf16.msra.mxu1 %v3905_v24  ;;  %v3241_v24 = vld [vmem:[%s4694_s1 + $0x70] sm:$0xff] }
 0x61c   :  { %2721 = vmatprep.subr.bf16.mxu1 %v4379_v8  ;;  %v3206_v8 = vld [vmem:[%s4694_s1 + $0x60] sm:$0xff] }
 0x61d   :  { %2389 = vmatmul.mubr.bf16.vlgmr.msra.gmra.mrb[36].mxu0 %v2034_v17  ;;  %v1151_v17 = vpop.xlane.xlu1 %1150 }
 0x61e   :  { %3696 = vmatprep.mubr.msk.bf16.mxu0 %vm4023_vm0, %v4022_v1  ;;  %3681 = vmatpush3.bf16.msra.mxu0 %v3892_v40  ;;  %v1152_v37 = vsub.f32 %v4384_v39, %v1151_v17  ;;  %v4652_v39 = vld [vmem:[%s4698_s5] ss:$0 sm:$0xff] }
 0x61f   :  { %3682 = vmatprep.subr.bf16.mxu0 %v4022_v1 }
 0x620   :  { %v1153_v40 = vmul.f32 1.442695, %v1152_v37 }
 0x622   :  { %3683 = vmatpush3.bf16.msra.mxu0 %v3894_v42 }
 0x623   :  { %3684 = vmatprep.subr.bf16.mxu0 %v4022_v1 }
 0x626   :  { %3685 = vmatpush3.bf16.msra.mxu0 %v3896_v44 }
 0x627   :  { %3686 = vmatprep.subr.bf16.mxu0 %v4022_v1 }
 0x62a   :  { %3687 = vmatpush3.bf16.msra.mxu0 %v3898_v46 }
 0x62b   :  { %3688 = vmatprep.subr.bf16.mxu0 %v4022_v1 }
 0x62e   :  { %3689 = vmatpush3.bf16.msra.mxu0 %v3900_v48 }
 0x62f   :  { %3690 = vmatprep.subr.bf16.mxu0 %v4022_v1 }
 0x632   :  { %3691 = vmatpush3.bf16.msra.mxu0 %v3902_v18 }
 0x633   :  { %3692 = vmatprep.subr.bf16.mxu0 %v4022_v1 }
 0x636   :  { %3693 = vmatpush3.bf16.msra.mxu0 %v3904_v23 }
 0x637   :  { %3694 = vmatprep.subr.bf16.mxu0 %v4022_v1 }
 0x63a   :  { %3695 = vmatpush3.bf16.msra.mxu0 %v3906_v25  ;;  %v3242_v25 = vld [vmem:[%s4694_s1 + $0x78] sm:$0xff] }
 0x63b   :  { %3700 = vmatprep.subr.bf16.mxu0 %v4022_v1 }
 0x6cf   :  { %v2238_v2 = vpop.f32.mrb[32].mxu1 }
 0x6d0   :  { %v2150_v27 = vpop.f32.mrb[32].mxu0  ;;  %v3658_v28 = vpop.f32.mrb[33].mxu1 }
 0x6d1   :  { %v2239_v29 = vadd.f32 %v2238_v2, %v2150_v27  ;;  %v3638_v30 = vpop.f32.mrb[33].mxu0  ;;  %v2241_v31 = vpop.f32.mrb[34].mxu1 }
 0x6d2   :  { %v2153_v19 = vpop.f32.mrb[34].mxu0  ;;  %v3659_v20 = vpop.f32.mrb[35].mxu1 }
 0x6d3   :  { %v3639_v21 = vpop.f32.mrb[35].mxu0  ;;  %v4600_v32 = vadd.f32 %v4256_v12, %v2239_v29  ;;  %v3908_v12 = vld [vmem:[#allocation4] sm:$0xff]  }
 0x6d5   :  { %2245 = vmax.xlane.f32.xlu1 %v4600_v32 }
 0x6f0   :  { %v2390_v34 = vpop.f32.mrb[36].mxu0 }
 0x6f1   :  { %v2397_v35 = vadd.f32 %v3206_v8, %v2390_v34  ;;  %v2392_v3 = vpop.f32.mrb[37].mxu0 }
 0x6f2   :  { %v2398_v5 = vadd.f32 %v3207_v33, %v2392_v3  ;;  %v2394_v6 = vpop.f32.mrb[38].mxu0 }
 0x6f3   :  { %v2399_v7 = vpack.c.bf16 %v2397_v35, %v2397_v35  ;;  %v2395_v9 = vpop.f32.mrb[39].mxu0 }
 0x6f4   :  { %v2416_v11 = vpack.c.bf16 %v2398_v5, %v2398_v5 }
 0x6f5   :  { %3697 = vmatmul.mubr.bf16.vlgmr.msra.gmra.mrb[40].mxu0 %v2399_v7 }
 0x6f6   :  { %3677 = vmatmul.mubr.bf16.vlgmr.msra.gmra.mrb[36].mxu1 %v2416_v11  ;;  %3716 = vmatprep.mubr.msk.bf16.mxu0 %vm4023_vm0, %v4022_v1 }
 0x6f7   :  { %2722 = vmatpush1.bf16.msra.mxu1 %v4396_v49  ;;  %2753 = vmatprep.mubr.bf16.mxu1 %v4021_v0  ;;  %v3907_v0 = vld [vmem:[#allocation2] sm:$0xff]   ;;  %v3909_v49 = vld [vmem:[#allocation2 + $0x8] sm:$0xff]  }
 0x6f8   :  { %2723 = vmatprep.subr.bf16.mxu1 %v4401_v52  ;;  %3701 = vmatpush3.bf16.msra.mxu0 %v3908_v12  ;;  %v3910_v52 = vld [vmem:[#allocation4 + $0x8] sm:$0xff]  }
 0x6f9   :  { %3702 = vmatprep.subr.bf16.mxu0 %v4022_v1 }
 0x6fb   :  { %2724 = vmatpush1.bf16.msra.mxu1 %v4409_v53  ;;  %v3911_v53 = vld [vmem:[#allocation2 + $0x10] sm:$0xff]  }
 0x6fc   :  { %2725 = vmatprep.subr.bf16.mxu1 %v4416_v54  ;;  %3703 = vmatpush3.bf16.msra.mxu0 %v3910_v52  ;;  %v3912_v54 = vld [vmem:[#allocation4 + $0x10] sm:$0xff]  }
 0x6fd   :  { %3704 = vmatprep.subr.bf16.mxu0 %v4022_v1 }
 0x6ff   :  { %2726 = vmatpush1.bf16.msra.mxu1 %v4422_v55  ;;  %v3913_v55 = vld [vmem:[#allocation2 + $0x18] sm:$0xff]  }
 0x700   :  { %2727 = vmatprep.subr.bf16.mxu1 %v4428_v56  ;;  %3705 = vmatpush3.bf16.msra.mxu0 %v3912_v54  ;;  %v3914_v56 = vld [vmem:[#allocation4 + $0x18] sm:$0xff]  }
 0x701   :  { %3706 = vmatprep.subr.bf16.mxu0 %v4022_v1 }
 0x703   :  { %2728 = vmatpush1.bf16.msra.mxu1 %v4434_v57  ;;  %v3915_v57 = vld [vmem:[#allocation2 + $0x20] sm:$0xff]  }
 0x704   :  { %2729 = vmatprep.subr.bf16.mxu1 %v4440_v58  ;;  %3707 = vmatpush3.bf16.msra.mxu0 %v3914_v56  ;;  %v3916_v58 = vld [vmem:[#allocation4 + $0x20] sm:$0xff]  }
 0x705   :  { %3708 = vmatprep.subr.bf16.mxu0 %v4022_v1 }
 0x707   :  { %2730 = vmatpush1.bf16.msra.mxu1 %v4446_v59  ;;  %v3917_v59 = vld [vmem:[#allocation2 + $0x28] sm:$0xff]  }
 0x708   :  { %2731 = vmatprep.subr.bf16.mxu1 %v4452_v60  ;;  %3709 = vmatpush3.bf16.msra.mxu0 %v3916_v58  ;;  %v3918_v60 = vld [vmem:[#allocation4 + $0x28] sm:$0xff]  }
 0x709   :  { %3710 = vmatprep.subr.bf16.mxu0 %v4022_v1 }
 0x70b   :  { %2732 = vmatpush1.bf16.msra.mxu1 %v4458_v61  ;;  %v3919_v61 = vld [vmem:[#allocation2 + $0x30] sm:$0xff]  }
 0x70c   :  { %2733 = vmatprep.subr.bf16.mxu1 %v4464_v62  ;;  %3711 = vmatpush3.bf16.msra.mxu0 %v3918_v60  ;;  %v3920_v62 = vld [vmem:[#allocation4 + $0x30] sm:$0xff]  }
 0x70d   :  { %3712 = vmatprep.subr.bf16.mxu0 %v4022_v1 }
 0x70f   :  { %2734 = vmatpush1.bf16.msra.mxu1 %v4470_v63  ;;  %v3921_v63 = vld [vmem:[#allocation2 + $0x38] sm:$0xff]  }
 0x710   :  { %2735 = vmatprep.subr.bf16.mxu1 %v4476_v10  ;;  %3713 = vmatpush3.bf16.msra.mxu0 %v3920_v62  ;;  %v3922_v10 = vld [vmem:[#allocation4 + $0x38] sm:$0xff]  }
 0x711   :  { %3714 = vmatprep.subr.bf16.mxu0 %v4022_v1 }
 0x713   :  { %2736 = vmatpush1.bf16.msra.mxu1 %v4482_v15  ;;  %v422_v15 = vpop.xlane.xlu0 %421 }
 0x714   :  { %3720 = vmatprep.subr.bf16.mxu1 %v4022_v1  ;;  %3715 = vmatpush3.bf16.msra.mxu0 %v3922_v10  ;;  %v423_v14 = vsub.f32 %v4259_v26, %v422_v15 }
 0x716   :  { %2754 = vmatmul.mubr.bf16.vlgmr.msra.gmra.mrb[40].mxu1 %v2399_v7  ;;  %v424_v36 = vmul.f32 1.442695, %v423_v14 }
 0x717   :  { %3736 = vmatprep.mubr.msk.bf16.mxu1 %vm4023_vm0, %v4022_v1  ;;  %3721 = vmatpush3.bf16.msra.mxu1 %v3907_v0  ;;  %v4645_v16 = vpop.xlane.xlu0 %785 }
 0x718   :  { %3722 = vmatprep.subr.bf16.mxu1 %v4022_v1  ;;  %3923 = vpow2.f32 %v424_v36  ;;  %v787_v54 = vsub.f32 %v4308_v50, %v4645_v16 }
 0x719   :  { %3925 = vpow2.f32 %v1153_v40 }
 0x71a   :  { %v788_v56 = vmul.f32 1.442695, %v787_v54 }
 0x71b   :  { %3723 = vmatpush3.bf16.msra.mxu1 %v3909_v49  ;;  %v1881_v38 = vpop.xlane.xlu0 %1880 }
 0x71c   :  { %3724 = vmatprep.subr.bf16.mxu1 %v4022_v1  ;;  %v1882_v41 = vsub.f32 %v4553_v4, %v1881_v38 }
 0x71e   :  { %v1883_v47 = vmul.f32 1.442695, %v1882_v41 }
 0x71f   :  { %3725 = vmatpush3.bf16.msra.mxu1 %v3911_v53 }
 0x720   :  { %3726 = vmatprep.subr.bf16.mxu1 %v4022_v1  ;;  %3927 = vpow2.f32 %v1883_v47 }
 0x722   :  { %v3924_v4 = vpop.eup %3923 }
 0x723   :  { %3727 = vmatpush3.bf16.msra.mxu1 %v3913_v55  ;;  %v3926_v22 = vpop.eup %3925  ;;  %v1516_v55 = vpop.xlane.xlu1 %1515 }
 0x724   :  { %3728 = vmatprep.subr.bf16.mxu1 %v4022_v1 }
 0x727   :  { %3729 = vmatpush3.bf16.msra.mxu1 %v3915_v57  ;;  %v1517_v57 = vsub.f32 %v4506_v13, %v1516_v55 }
 0x728   :  { %3730 = vmatprep.subr.bf16.mxu1 %v4022_v1 }
 0x72a   :  { %v3928_v23 = vpop.eup %3927 }
 0x72b   :  { %3731 = vmatpush3.bf16.msra.mxu1 %v3917_v59  ;;  %v1518_v59 = vmul.f32 1.442695, %v1517_v57 }
 0x72c   :  { %3732 = vmatprep.subr.bf16.mxu1 %v4022_v1 }
 0x72f   :  { %3733 = vmatpush3.bf16.msra.mxu1 %v3919_v61 }
 0x730   :  { %3734 = vmatprep.subr.bf16.mxu1 %v4022_v1 }
 0x733   :  { %3735 = vmatpush3.bf16.msra.mxu1 %v3921_v63 }
 0x762   :  { %v2246_v58 = vpop.xlane.xlu1 %2245 }
 0x763   :  { %v2247_v60 = vsub.f32 %v4600_v32, %v2246_v58 }
 0x765   :  { %v2248_v17 = vmul.f32 1.442695, %v2247_v60 }
 0x7c8   :  { %v2603_v42 = vpop.f32.mrb[40].mxu0 }
 0x7c9   :  { %v2515_v1 = vpop.f32.mrb[36].mxu1  ;;  %v3698_v43 = vpop.f32.mrb[41].mxu0 }
 0x7ca   :  { %v2604_v44 = vadd.f32 %v2603_v42, %v2515_v1  ;;  %v3678_v45 = vpop.f32.mrb[37].mxu1  ;;  %v2606_v46 = vpop.f32.mrb[42].mxu0 }
 0x7cb   :  { %v2518_v26 = vpop.f32.mrb[38].mxu1  ;;  %v3699_v48 = vpop.f32.mrb[43].mxu0 }
 0x7cc   :  { %v3679_v51 = vpop.f32.mrb[39].mxu1  ;;  %v2609_v18 = vadd.f32 %v4652_v39, %v2604_v44 }
 0x7ce   :  { %2610 = vmax.xlane.f32.xlu0 %v2609_v18 }
 0x7d2   :  { %426 = vadd.xlane.f32.xlu0 %v3924_v4 }
 0x7d6   :  { %1155 = vadd.xlane.f32.xlu0 %v3926_v22 }
 0x7da   :  { %1885 = vadd.xlane.f32.xlu0 %v3928_v23 }
 0x7e9   :  { %v2755_v2 = vpop.f32.mrb[40].mxu1 }
 0x7ea   :  { %v2762_v27 = vadd.f32 %v3241_v24, %v2755_v2  ;;  %v2757_v28 = vpop.f32.mrb[41].mxu1 }
 0x7eb   :  { %v2763_v29 = vadd.f32 %v3242_v25, %v2757_v28  ;;  %v2759_v30 = vpop.f32.mrb[42].mxu1 }
 0x7ec   :  { %v2764_v31 = vpack.c.bf16 %v2762_v27, %v2762_v27  ;;  %2987 = vst [vmem:[%s4700_s7] sm:$0xff] %v2762_v27  ;;  %v2760_v19 = vpop.f32.mrb[43].mxu1 }
 0x7ed   :  { %v2781_v20 = vpack.c.bf16 %v2763_v29, %v2763_v29 }
 0x7ee   :  { %3737 = vmatmul.mubr.bf16.vlgmr.msra.gmra.mrb[44].mxu1 %v2764_v31 }
 0x7ef   :  { %3717 = vmatmul.mubr.bf16.vlgmr.msra.gmra.mrb[44].mxu0 %v2781_v20 }
 0x85b   :  { %v2611_v21 = vpop.xlane.xlu0 %2610 }
 0x85c   :  { %v2612_v8 = vsub.f32 %v2609_v18, %v2611_v21 }
 0x85e   :  { %v2613_v33 = vmul.f32 1.442695, %v2612_v8 }
 0x85f   :  { %v427_v34 = vpop.xlane.xlu0 %426 }
 0x860   :  { %3929 = vpow2.f32 %v2613_v33 }
 0x861   :  { %3931 = vlog2.f32 %v427_v34 }
 0x863   :  { %v1156_v35 = vpop.xlane.xlu0 %1155 }
 0x864   :  { %3933 = vlog2.f32 %v1156_v35 }
 0x867   :  { %v1886_v3 = vpop.xlane.xlu0 %1885 }
 0x868   :  { %3935 = vlog2.f32 %v1886_v3 }
 0x869   :  { %3937 = vpow2.f32 %v788_v56 }
 0x86a   :  { %v3930_v5 = vpop.eup %3929  ;;  %3939 = vpow2.f32 %v1518_v59 }
 0x86b   :  { %v3932_v6 = vpop.eup %3931  ;;  %2615 = vadd.xlane.f32.xlu0 %v3930_v5  ;;  %3941 = vpow2.f32 %v2248_v17 }
 0x86c   :  { %v429_v7 = vmul.f32 0.6931472, %v3932_v6 }
 0x86e   :  { %v3934_v9 = vpop.eup %3933  ;;  %v430_v11 = vsub.f32 %v423_v14, %v429_v7 }
 0x86f   :  { %v1158_v0 = vmul.f32 0.6931472, %v3934_v9 }
 0x870   :  { %431 = vst [vmem:[%s4699_s6] sm:$0xff] %v430_v11 }
 0x871   :  { %v1159_v12 = vsub.f32 %v1152_v37, %v1158_v0 }
 0x872   :  { %v3936_v49 = vpop.eup %3935 }
 0x873   :  { %3100 = vst [vmem:[%s4699_s6 + $0x10] sm:$0xff] %v1159_v12  ;;  %v1888_v52 = vmul.f32 0.6931472, %v3936_v49  ;;  %v3938_v13 = vpop.eup %3937 }
 0x874   :  { %v3940_v38 = vpop.eup %3939 }
 0x875   :  { %v1889_v53 = vsub.f32 %v1882_v41, %v1888_v52  ;;  %v3942_v32 = vpop.eup %3941 }
 0x877   :  { %3170 = vst [vmem:[%s4699_s6 + $0x20] sm:$0xff] %v1889_v53 }
 0x8c1   :  { %v2968_v61 = vpop.f32.mrb[44].mxu1 }
 0x8c2   :  { %v2880_v62 = vpop.f32.mrb[44].mxu0  ;;  %v3738_v63 = vpop.f32.mrb[45].mxu1 }
 0x8c3   :  { %v2969_v10 = vadd.f32 %v2968_v61, %v2880_v62  ;;  %v3718_v15 = vpop.f32.mrb[45].mxu0  ;;  %v2971_v14 = vpop.f32.mrb[46].mxu1 }
 0x8c4   :  { %v2883_v36 = vpop.f32.mrb[46].mxu0  ;;  %v3739_v37 = vpop.f32.mrb[47].mxu1 }
 0x8c5   :  { %v3719_v50 = vpop.f32.mrb[47].mxu0  ;;  %v2974_v16 = vadd.f32 %v4652_v39, %v2969_v10 }
 0x8c7   :  { %2975 = vmax.xlane.f32.xlu1 %v2974_v16 }
 0x8cb   :  { %790 = vadd.xlane.f32.xlu1 %v3938_v13 }
 0x8cf   :  { %1520 = vadd.xlane.f32.xlu1 %v3940_v38 }
 0x8d3   :  { %2250 = vadd.xlane.f32.xlu1 %v3942_v32 }
 0x8f8   :  { %v2616_v40 = vpop.xlane.xlu0 %2615 }
 0x8f9   :  { %3943 = vlog2.f32 %v2616_v40 }
 0x903   :  { %v3944_v41 = vpop.eup %3943 }
 0x904   :  { %v2618_v42 = vmul.f32 0.6931472, %v3944_v41 }
 0x906   :  { %v2619_v1 = vsub.f32 %v2612_v8, %v2618_v42 }
 0x908   :  { %3240 = vst [vmem:[%s4699_s6 + $0x30] sm:$0xff] %v2619_v1 }
 0x954   :  { %v2976_v43 = vpop.xlane.xlu1 %2975 }
 0x955   :  { %v2977_v44 = vsub.f32 %v2974_v16, %v2976_v43 }
 0x957   :  { %v2978_v45 = vmul.f32 1.442695, %v2977_v44 }
 0x958   :  { %v791_v46 = vpop.xlane.xlu1 %790 }
 0x959   :  { %3945 = vpow2.f32 %v2978_v45 }
 0x95a   :  { %3947 = vlog2.f32 %v791_v46 }
 0x95c   :  { %v1521_v47 = vpop.xlane.xlu1 %1520 }
 0x95d   :  { %3949 = vlog2.f32 %v1521_v47 }
 0x960   :  { %v2251_v26 = vpop.xlane.xlu1 %2250 }
 0x961   :  { %3951 = vlog2.f32 %v2251_v26 }
 0x963   :  { %v3946_v48 = vpop.eup %3945 }
 0x964   :  { %v3948_v51 = vpop.eup %3947  ;;  %2980 = vadd.xlane.f32.xlu1 %v3946_v48 }
 0x965   :  { %v793_v39 = vmul.f32 0.6931472, %v3948_v51 }
 0x967   :  { %v3950_v18 = vpop.eup %3949  ;;  %v794_v4 = vsub.f32 %v787_v54, %v793_v39 }
 0x968   :  { %v1523_v22 = vmul.f32 0.6931472, %v3950_v18 }
 0x969   :  { %3065 = vst [vmem:[%s4699_s6 + $0x8] sm:$0xff] %v794_v4 }
 0x96a   :  { %v1524_v23 = vsub.f32 %v1517_v57, %v1523_v22 }
 0x96b   :  { %v3952_v24 = vpop.eup %3951 }
 0x96c   :  { %3135 = vst [vmem:[%s4699_s6 + $0x18] sm:$0xff] %v1524_v23  ;;  %v2253_v25 = vmul.f32 0.6931472, %v3952_v24 }
 0x96e   :  { %v2254_v2 = vsub.f32 %v2247_v60, %v2253_v25 }
 0x970   :  { %3205 = vst [vmem:[%s4699_s6 + $0x28] sm:$0xff] %v2254_v2 }
 0x9f1   :  { %v2981_v27 = vpop.xlane.xlu1 %2980 }
 0x9f2   :  { %3953 = vlog2.f32 %v2981_v27 }
 0x9fc   :  { %v3954_v28 = vpop.eup %3953 }
 0x9fd   :  { %v2983_v29 = vmul.f32 0.6931472, %v3954_v28 }
 0x9ff   :  { %v2984_v30 = vsub.f32 %v2977_v44, %v2983_v29 }
 0xa01   :  { %3275 = vst [vmem:[%s4699_s6 + $0x38] sm:$0xff] %v2984_v30 }
 0xa02   :  { %2996 = vsyncpa [#allocation3], 1 }
 0xa03   :  { %2997 = vsyncpa [#allocation5], 1 }

</bundles_post_ra>
